<compile_context>
chip_gen: v7x
topology: tpu7x:2x2x1
jax: 0.10.0
libtpu: 0.0.40
codegen_flags: <defaults>
</compile_context>

<pallas_src>
import functools

import jax
import jax.numpy as jnp
from jax import lax
from jax.experimental import pallas as pl
from jax.experimental.pallas import tpu as pltpu


def make_midle_block_kernel(N, H, W, C, K, pad, eps):
    R = N * H
    L = W * C
    inv_m = 1.0 / float(N * H * W)
    KK = K * K

    def kernel(x_ref, dw_ref, pw_ref, ssel_ref, sselT_ref, gb_ref, o_ref):
        ssel = ssel_ref[...]          # (L, C)  lane -> channel group-sum selector
        sselT = sselT_ref[...]        # (C, L)  channel -> lane broadcast
        # Row selectors used to stack pairs of rows without concatenation.
        row2L = lax.broadcasted_iota(jnp.int32, (2, L), 0)
        row2C = lax.broadcasted_iota(jnp.int32, (2, C), 0)

        def sep_block(x, bi):
            # ReLU (lane-dense elementwise).
            x = jnp.maximum(x, 0.0)

            # Depthwise 3x3, stride 1, pad 1.  Height taps = sublane rolls,
            # width taps = lane rolls (XLU).  Both boundary masks are already
            # folded into the pre-broadcast (R, L) per-tap weights.
            acc = None
            for dy in range(K):
                offy = dy - pad
                xd = x if offy == 0 else pltpu.roll(x, shift=(-offy) % R, axis=0)
                for dx in range(K):
                    offx = dx - pad
                    tap = xd if offx == 0 else pltpu.roll(
                        xd, shift=(-offx * C) % L, axis=1)
                    wt = dw_ref[bi * KK + dy * K + dx]   # (R, L), masks folded in
                    term = tap * wt
                    acc = term if acc is None else acc + term

            # Pointwise 1x1 conv: block-diagonal weight -> (R,L)@(L,L) MXU matmul.
            y = jnp.dot(acc, pw_ref[bi], preferred_element_type=jnp.float32)

            # BatchNorm2d (training-mode biased batch stats), single pass.
            ssum = jnp.sum(y, axis=0, keepdims=True)        # (1, L)
            ssq = jnp.sum(y * y, axis=0, keepdims=True)     # (1, L)
            stats = jnp.where(row2L == 0, ssum, ssq)        # (2, L) row-stack
            stats_c = jnp.dot(stats, ssel,
                              preferred_element_type=jnp.float32) * inv_m  # (2, C)
            mean = stats_c[0:1]                             # (1, C)
            var = jnp.maximum(stats_c[1:2] - mean * mean, 0.0)  # clamp >= 0
            gb = gb_ref[bi]                                 # (2, C): gamma, beta
            scale_c = gb[0:1] * lax.rsqrt(var + eps)        # (1, C)
            shift_c = gb[1:2] - mean * scale_c              # (1, C)
            ss_c = jnp.where(row2C == 0, scale_c, shift_c)  # (2, C) row-stack
            ss_l = jnp.dot(ss_c, sselT,
                           preferred_element_type=jnp.float32)   # (2, L)
            return y * ss_l[0:1] + ss_l[1:2]

        x = x_ref[...]
        x = sep_block(x, 0)
        x = sep_block(x, 1)
        x = sep_block(x, 2)
        o_ref[...] = x

    return kernel


def pack_midle_block_params(params, x_shape):
    """Pack MidleBlock params into the kernel's fused/pre-broadcast constants.

    params: dict with dw{i}: (C,1,K,K), pw{i}: (C,C) [Cout,Cin], g{i}, b{i}: (C,),
            'ksize'.  x_shape: (N, C, H, W).  Call once; reuse across forwards.
    """
    N, C, H, W = x_shape
    K = int(params["ksize"])
    if K != 3:
        # The module hard-codes padding=1; this kernel is specialised for k=3.
        raise NotImplementedError("Pallas MidleBlock kernel supports ksize=3 only")
    pad = 1
    R, L = N * H, W * C
    f32 = jnp.float32

    ssel = jnp.tile(jnp.eye(C, dtype=f32), (W, 1))       # (L, C)
    sselT = jnp.transpose(ssel)                          # (C, L)

    h = jnp.arange(R) % H                                # per-row height index
    wpos = jnp.arange(L) // C                            # per-lane width index

    dwb_rows, pw_list, gb_list = [], [], []
    for i in (1, 2, 3):
        k_dw = params[f"dw{i}"].astype(f32)[:, 0]        # (C, K, K)
        for dy in range(K):
            offy = dy - pad
            hvalid = ((h + offy) >= 0) & ((h + offy) < H)            # (R,)
            for dx in range(K):
                offx = dx - pad
                wvalid = ((wpos + offx) >= 0) & ((wpos + offx) < W)   # (L,)
                lane_w = jnp.tile(k_dw[:, dy, dx], W) * wvalid.astype(f32)  # (L,)
                dwb_rows.append(hvalid.astype(f32)[:, None] * lane_w[None, :])
        pw_used = jnp.transpose(params[f"pw{i}"].astype(f32))         # (Cin, Cout)
        pw_list.append(jnp.kron(jnp.eye(W, dtype=f32), pw_used))      # (L, L)
        gb_list.append(jnp.stack([params[f"g{i}"].astype(f32),
                                  params[f"b{i}"].astype(f32)]))      # (2, C)

    return {
        "dwb": jnp.stack(dwb_rows),      # (3*K*K, R, L) pre-broadcast + masked
        "pwbd": jnp.stack(pw_list),      # (3, L, L) block-diagonal kron(I_W, pw)
        "gb": jnp.stack(gb_list),        # (3, 2, C)
        "ssel": ssel,                    # (L, C)
        "sselT": sselT,                  # (C, L)
        "ksize": K,
    }


@functools.partial(jax.jit, static_argnames=("ksize",))
def _midle_block_forward_packed(x_nchw, dwb, pwbd, gb, ssel, sselT, *, ksize):
    N, C, H, W = x_nchw.shape
    K, pad, eps = ksize, 1, 1e-5
    R, L = N * H, W * C
    f32 = jnp.float32

    # NCHW -> fused lane-dense (N*H, W*C) layout.
    x = jnp.transpose(x_nchw, (0, 2, 3, 1)).astype(f32).reshape(R, L)

    kernel = make_midle_block_kernel(N, H, W, C, K, pad, eps)
    out_flat = pl.pallas_call(
        kernel,
        out_shape=jax.ShapeDtypeStruct((R, L), f32),
        in_specs=[pl.BlockSpec(memory_space=pltpu.MemorySpace.VMEM)] * 6,
        out_specs=pl.BlockSpec(memory_space=pltpu.MemorySpace.VMEM),
        input_output_aliases={0: 0},   # x is dead after block 1; reuse its buffer
    )(x, dwb, pwbd, ssel, sselT, gb)

    # (N*H, W*C) -> NCHW
    return jnp.transpose(out_flat.reshape(N, H, W, C), (0, 3, 1, 2))


def midle_block_forward(x_nchw, params, packed=None):
    if packed is None:
        packed = pack_midle_block_params(params, x_nchw.shape)
    return _midle_block_forward_packed(
        x_nchw, packed["dwb"], packed["pwbd"], packed["gb"],
        packed["ssel"], packed["sselT"], ksize=packed["ksize"])


# ----------------------- pure-JAX reference ------------------------------- #
def ref_sep_block(x_nhwc, w_dw, w_pw, gamma, beta, pad=1, eps=1e-5):
    N, H, W, C = x_nhwc.shape
    x = jnp.maximum(x_nhwc, 0.0)
    rhs_dw = jnp.transpose(w_dw[:, 0], (1, 2, 0))[:, :, None, :]   # (K,K,1,C)
    y = lax.conv_general_dilated(
        x, rhs_dw, window_strides=(1, 1), padding=((pad, pad), (pad, pad)),
        dimension_numbers=("NHWC", "HWIO", "NHWC"), feature_group_count=C)
    rhs_pw = jnp.transpose(w_pw, (1, 0))[None, None]               # (1,1,Ci,Co)
    y = lax.conv_general_dilated(
        y, rhs_pw, window_strides=(1, 1), padding="VALID",
        dimension_numbers=("NHWC", "HWIO", "NHWC"))
    mean = jnp.mean(y, axis=(0, 1, 2))
    var = jnp.mean((y - mean) ** 2, axis=(0, 1, 2))
    return (y - mean) * lax.rsqrt(var + eps) * gamma + beta


def ref_midle_block(x_nchw, params):
    x = jnp.transpose(x_nchw, (0, 2, 3, 1)).astype(jnp.float32)
    for i in (1, 2, 3):
        x = ref_sep_block(x, params[f"dw{i}"], params[f"pw{i}"],
                          params[f"g{i}"], params[f"b{i}"])
    return jnp.transpose(x, (0, 3, 1, 2))


# ------------------------------- main -------------------------------------- #
if __name__ == "__main__":
    N, C, H, W = 2, 8, 16, 16
    ksize = 3

    key = jax.random.PRNGKey(0)
    keys = jax.random.split(key, 13)
    params = {"ksize": ksize}
    k_it = iter(keys)
    x = jax.random.normal(next(k_it), (N, C, H, W), dtype=jnp.float32)
    for i in (1, 2, 3):
        params[f"dw{i}"] = 0.2 * jax.random.normal(next(k_it), (C, 1, ksize, ksize), jnp.float32)
        params[f"pw{i}"] = 0.2 * jax.random.normal(next(k_it), (C, C), jnp.float32)
        params[f"g{i}"] = 1.0 + 0.1 * jax.random.normal(next(k_it), (C,), jnp.float32)
        params[f"b{i}"] = 0.05 * jax.random.normal(next(k_it), (C,), jnp.float32)

    # Pack kernel constants once (cached across calls), then run the jitted fwd.
    packed = pack_midle_block_params(params, x.shape)
    out = midle_block_forward(x, params, packed=packed)
    out = jax.block_until_ready(out)

    ref = jax.block_until_ready(ref_midle_block(x, params))
    assert out.shape == (N, C, H, W)
    assert jnp.allclose(out, ref, atol=1e-3, rtol=1e-3), (
        f"max abs err {float(jnp.max(jnp.abs(out - ref)))}")

    print("KERNEL_OK")
</pallas_src>

<mosaic_0001>
module attributes {stable_mosaic.version = 11 : i64} {
  func.func @kernel(%arg0: memref<32x128xf32, #tpu.memory_space<vmem>>, %arg1: memref<27x32x128xf32, #tpu.memory_space<vmem>>, %arg2: memref<3x128x128xf32, #tpu.memory_space<vmem>>, %arg3: memref<128x8xf32, #tpu.memory_space<vmem>>, %arg4: memref<8x128xf32, #tpu.memory_space<vmem>>, %arg5: memref<3x2x8xf32, #tpu.memory_space<vmem>>, %arg6: memref<32x128xf32, #tpu.memory_space<vmem>>) attributes {dimension_semantics = [], scalar_prefetch = 0 : i64, scratch_operands = 0 : i64, tpu.core_type = #tpu.core_type<tc>} {
    %c0 = arith.constant 0 : index
    %c0_0 = arith.constant 0 : index
    %0 = vector.load %arg3[%c0, %c0_0] : memref<128x8xf32, #tpu.memory_space<vmem>>, vector<128x8xf32>
    %c0_1 = arith.constant 0 : index
    %c0_2 = arith.constant 0 : index
    %1 = vector.load %arg4[%c0_1, %c0_2] : memref<8x128xf32, #tpu.memory_space<vmem>>, vector<8x128xf32>
    %2 = tpu.iota {dimensions = array<i32: 0>} : vector<2x128xi32>
    %3 = tpu.iota {dimensions = array<i32: 0>} : vector<2x8xi32>
    %c0_3 = arith.constant 0 : index
    %c0_4 = arith.constant 0 : index
    %4 = vector.load %arg0[%c0_3, %c0_4] : memref<32x128xf32, #tpu.memory_space<vmem>>, vector<32x128xf32>
    %cst = arith.constant 0.000000e+00 : f32
    %5 = vector.broadcast %cst : f32 to vector<32x128xf32>
    %6 = arith.maximumf %4, %5 : vector<32x128xf32>
    %c1_i32 = arith.constant 1 : i32
    %7 = tpu.dynamic_rotate %6 by %c1_i32 dim 0 : vector<32x128xf32>, i32 -> vector<32x128xf32>
    %c8_i32 = arith.constant 8 : i32
    %8 = tpu.dynamic_rotate %7 by %c8_i32 dim 1 : vector<32x128xf32>, i32 -> vector<32x128xf32>
    %c0_5 = arith.constant 0 : index
    %c0_6 = arith.constant 0 : index
    %c0_7 = arith.constant 0 : index
    %9 = vector.load %arg1[%c0_5, %c0_6, %c0_7] : memref<27x32x128xf32, #tpu.memory_space<vmem>>, vector<1x32x128xf32>
    %10 = vector.shape_cast %9 : vector<1x32x128xf32> to vector<32x128xf32>
    %11 = arith.mulf %8, %10 : vector<32x128xf32>
    %c1 = arith.constant 1 : index
    %c0_8 = arith.constant 0 : index
    %c0_9 = arith.constant 0 : index
    %12 = vector.load %arg1[%c1, %c0_8, %c0_9] : memref<27x32x128xf32, #tpu.memory_space<vmem>>, vector<1x32x128xf32>
    %13 = vector.shape_cast %12 : vector<1x32x128xf32> to vector<32x128xf32>
    %14 = arith.mulf %7, %13 : vector<32x128xf32>
    %15 = arith.addf %11, %14 : vector<32x128xf32>
    %c120_i32 = arith.constant 120 : i32
    %16 = tpu.dynamic_rotate %7 by %c120_i32 dim 1 : vector<32x128xf32>, i32 -> vector<32x128xf32>
    %c2 = arith.constant 2 : index
    %c0_10 = arith.constant 0 : index
    %c0_11 = arith.constant 0 : index
    %17 = vector.load %arg1[%c2, %c0_10, %c0_11] : memref<27x32x128xf32, #tpu.memory_space<vmem>>, vector<1x32x128xf32>
    %18 = vector.shape_cast %17 : vector<1x32x128xf32> to vector<32x128xf32>
    %19 = arith.mulf %16, %18 : vector<32x128xf32>
    %20 = arith.addf %15, %19 : vector<32x128xf32>
    %c8_i32_12 = arith.constant 8 : i32
    %21 = tpu.dynamic_rotate %6 by %c8_i32_12 dim 1 : vector<32x128xf32>, i32 -> vector<32x128xf32>
    %c3 = arith.constant 3 : index
    %c0_13 = arith.constant 0 : index
    %c0_14 = arith.constant 0 : index
    %22 = vector.load %arg1[%c3, %c0_13, %c0_14] : memref<27x32x128xf32, #tpu.memory_space<vmem>>, vector<1x32x128xf32>
    %23 = vector.shape_cast %22 : vector<1x32x128xf32> to vector<32x128xf32>
    %24 = arith.mulf %21, %23 : vector<32x128xf32>
    %25 = arith.addf %20, %24 : vector<32x128xf32>
    %c4 = arith.constant 4 : index
    %c0_15 = arith.constant 0 : index
    %c0_16 = arith.constant 0 : index
    %26 = vector.load %arg1[%c4, %c0_15, %c0_16] : memref<27x32x128xf32, #tpu.memory_space<vmem>>, vector<1x32x128xf32>
    %27 = vector.shape_cast %26 : vector<1x32x128xf32> to vector<32x128xf32>
    %28 = arith.mulf %6, %27 : vector<32x128xf32>
    %29 = arith.addf %25, %28 : vector<32x128xf32>
    %c120_i32_17 = arith.constant 120 : i32
    %30 = tpu.dynamic_rotate %6 by %c120_i32_17 dim 1 : vector<32x128xf32>, i32 -> vector<32x128xf32>
    %c5 = arith.constant 5 : index
    %c0_18 = arith.constant 0 : index
    %c0_19 = arith.constant 0 : index
    %31 = vector.load %arg1[%c5, %c0_18, %c0_19] : memref<27x32x128xf32, #tpu.memory_space<vmem>>, vector<1x32x128xf32>
    %32 = vector.shape_cast %31 : vector<1x32x128xf32> to vector<32x128xf32>
    %33 = arith.mulf %30, %32 : vector<32x128xf32>
    %34 = arith.addf %29, %33 : vector<32x128xf32>
    %c31_i32 = arith.constant 31 : i32
    %35 = tpu.dynamic_rotate %6 by %c31_i32 dim 0 : vector<32x128xf32>, i32 -> vector<32x128xf32>
    %c8_i32_20 = arith.constant 8 : i32
    %36 = tpu.dynamic_rotate %35 by %c8_i32_20 dim 1 : vector<32x128xf32>, i32 -> vector<32x128xf32>
    %c6 = arith.constant 6 : index
    %c0_21 = arith.constant 0 : index
    %c0_22 = arith.constant 0 : index
    %37 = vector.load %arg1[%c6, %c0_21, %c0_22] : memref<27x32x128xf32, #tpu.memory_space<vmem>>, vector<1x32x128xf32>
    %38 = vector.shape_cast %37 : vector<1x32x128xf32> to vector<32x128xf32>
    %39 = arith.mulf %36, %38 : vector<32x128xf32>
    %40 = arith.addf %34, %39 : vector<32x128xf32>
    %c7 = arith.constant 7 : index
    %c0_23 = arith.constant 0 : index
    %c0_24 = arith.constant 0 : index
    %41 = vector.load %arg1[%c7, %c0_23, %c0_24] : memref<27x32x128xf32, #tpu.memory_space<vmem>>, vector<1x32x128xf32>
    %42 = vector.shape_cast %41 : vector<1x32x128xf32> to vector<32x128xf32>
    %43 = arith.mulf %35, %42 : vector<32x128xf32>
    %44 = arith.addf %40, %43 : vector<32x128xf32>
    %c120_i32_25 = arith.constant 120 : i32
    %45 = tpu.dynamic_rotate %35 by %c120_i32_25 dim 1 : vector<32x128xf32>, i32 -> vector<32x128xf32>
    %c8 = arith.constant 8 : index
    %c0_26 = arith.constant 0 : index
    %c0_27 = arith.constant 0 : index
    %46 = vector.load %arg1[%c8, %c0_26, %c0_27] : memref<27x32x128xf32, #tpu.memory_space<vmem>>, vector<1x32x128xf32>
    %47 = vector.shape_cast %46 : vector<1x32x128xf32> to vector<32x128xf32>
    %48 = arith.mulf %45, %47 : vector<32x128xf32>
    %49 = arith.addf %44, %48 : vector<32x128xf32>
    %c0_28 = arith.constant 0 : index
    %c0_29 = arith.constant 0 : index
    %c0_30 = arith.constant 0 : index
    %50 = vector.load %arg2[%c0_28, %c0_29, %c0_30] : memref<3x128x128xf32, #tpu.memory_space<vmem>>, vector<1x128x128xf32>
    %51 = vector.shape_cast %50 : vector<1x128x128xf32> to vector<128x128xf32>
    %cst_31 = arith.constant dense<0.000000e+00> : vector<32x128xf32>
    %52 = tpu.matmul %49, %51, %cst_31 {dimension_numbers = #tpu.dot_dimension_numbers<[1], [0], [0], [1], [0, 0, 1, 1], [], []>} : vector<32x128xf32>, vector<128x128xf32>, vector<32x128xf32> -> vector<32x128xf32>
    %cst_32 = arith.constant dense<0.000000e+00> : vector<128xf32>
    %53 = vector.multi_reduction <add>, %52, %cst_32 [0] : vector<32x128xf32> to vector<128xf32>
    %54 = vector.shape_cast %53 : vector<128xf32> to vector<1x128xf32>
    %55 = arith.mulf %52, %52 : vector<32x128xf32>
    %cst_33 = arith.constant dense<0.000000e+00> : vector<128xf32>
    %56 = vector.multi_reduction <add>, %55, %cst_33 [0] : vector<32x128xf32> to vector<128xf32>
    %57 = vector.shape_cast %56 : vector<128xf32> to vector<1x128xf32>
    %c0_i32 = arith.constant 0 : i32
    %58 = vector.broadcast %c0_i32 : i32 to vector<2x128xi32>
    %59 = arith.cmpi eq, %2, %58 : vector<2x128xi32>
    %60 = vector.shape_cast %54 : vector<1x128xf32> to vector<1x128xf32>
    %61 = vector.broadcast %60 : vector<1x128xf32> to vector<2x128xf32>
    %62 = vector.shape_cast %57 : vector<1x128xf32> to vector<1x128xf32>
    %63 = vector.broadcast %62 : vector<1x128xf32> to vector<2x128xf32>
    %64 = arith.select %59, %61, %63 : vector<2x128xi1>, vector<2x128xf32>
    %cst_34 = arith.constant dense<0.000000e+00> : vector<2x8xf32>
    %65 = tpu.matmul %64, %0, %cst_34 {dimension_numbers = #tpu.dot_dimension_numbers<[1], [0], [0], [1], [0, 0, 1, 1], [], []>} : vector<2x128xf32>, vector<128x8xf32>, vector<2x8xf32> -> vector<2x8xf32>
    %cst_35 = arith.constant 0.001953125 : f32
    %66 = vector.broadcast %cst_35 : f32 to vector<2x8xf32>
    %67 = arith.mulf %65, %66 : vector<2x8xf32>
    %68 = vector.extract_strided_slice %67 {offsets = [0, 0], sizes = [1, 8], strides = [1, 1]} : vector<2x8xf32> to vector<1x8xf32>
    %69 = vector.extract_strided_slice %67 {offsets = [1, 0], sizes = [1, 8], strides = [1, 1]} : vector<2x8xf32> to vector<1x8xf32>
    %70 = arith.mulf %68, %68 : vector<1x8xf32>
    %71 = arith.subf %69, %70 : vector<1x8xf32>
    %cst_36 = arith.constant 0.000000e+00 : f32
    %72 = vector.broadcast %cst_36 : f32 to vector<1x8xf32>
    %73 = arith.maximumf %71, %72 : vector<1x8xf32>
    %c0_37 = arith.constant 0 : index
    %c0_38 = arith.constant 0 : index
    %c0_39 = arith.constant 0 : index
    %74 = vector.load %arg5[%c0_37, %c0_38, %c0_39] : memref<3x2x8xf32, #tpu.memory_space<vmem>>, vector<1x2x8xf32>
    %75 = vector.shape_cast %74 : vector<1x2x8xf32> to vector<2x8xf32>
    %76 = vector.extract_strided_slice %75 {offsets = [0, 0], sizes = [1, 8], strides = [1, 1]} : vector<2x8xf32> to vector<1x8xf32>
    %cst_40 = arith.constant 9.99999974E-6 : f32
    %77 = vector.broadcast %cst_40 : f32 to vector<1x8xf32>
    %78 = arith.addf %73, %77 : vector<1x8xf32>
    %79 = math.rsqrt %78 : vector<1x8xf32>
    %80 = arith.mulf %76, %79 : vector<1x8xf32>
    %81 = vector.extract_strided_slice %75 {offsets = [1, 0], sizes = [1, 8], strides = [1, 1]} : vector<2x8xf32> to vector<1x8xf32>
    %82 = arith.mulf %68, %80 : vector<1x8xf32>
    %83 = arith.subf %81, %82 : vector<1x8xf32>
    %c0_i32_41 = arith.constant 0 : i32
    %84 = vector.broadcast %c0_i32_41 : i32 to vector<2x8xi32>
    %85 = arith.cmpi eq, %3, %84 : vector<2x8xi32>
    %86 = vector.shape_cast %80 : vector<1x8xf32> to vector<1x8xf32>
    %87 = vector.broadcast %86 : vector<1x8xf32> to vector<2x8xf32>
    %88 = vector.shape_cast %83 : vector<1x8xf32> to vector<1x8xf32>
    %89 = vector.broadcast %88 : vector<1x8xf32> to vector<2x8xf32>
    %90 = arith.select %85, %87, %89 : vector<2x8xi1>, vector<2x8xf32>
    %cst_42 = arith.constant dense<0.000000e+00> : vector<2x128xf32>
    %91 = tpu.matmul %90, %1, %cst_42 {dimension_numbers = #tpu.dot_dimension_numbers<[1], [0], [0], [1], [0, 0, 1, 1], [], []>} : vector<2x8xf32>, vector<8x128xf32>, vector<2x128xf32> -> vector<2x128xf32>
    %92 = vector.extract_strided_slice %91 {offsets = [0, 0], sizes = [1, 128], strides = [1, 1]} : vector<2x128xf32> to vector<1x128xf32>
    %93 = vector.broadcast %92 : vector<1x128xf32> to vector<32x128xf32>
    %94 = arith.mulf %52, %93 : vector<32x128xf32>
    %95 = vector.extract_strided_slice %91 {offsets = [1, 0], sizes = [1, 128], strides = [1, 1]} : vector<2x128xf32> to vector<1x128xf32>
    %96 = vector.broadcast %95 : vector<1x128xf32> to vector<32x128xf32>
    %97 = arith.addf %94, %96 : vector<32x128xf32>
    %cst_43 = arith.constant 0.000000e+00 : f32
    %98 = vector.broadcast %cst_43 : f32 to vector<32x128xf32>
    %99 = arith.maximumf %97, %98 : vector<32x128xf32>
    %c1_i32_44 = arith.constant 1 : i32
    %100 = tpu.dynamic_rotate %99 by %c1_i32_44 dim 0 : vector<32x128xf32>, i32 -> vector<32x128xf32>
    %c8_i32_45 = arith.constant 8 : i32
    %101 = tpu.dynamic_rotate %100 by %c8_i32_45 dim 1 : vector<32x128xf32>, i32 -> vector<32x128xf32>
    %c9 = arith.constant 9 : index
    %c0_46 = arith.constant 0 : index
    %c0_47 = arith.constant 0 : index
    %102 = vector.load %arg1[%c9, %c0_46, %c0_47] : memref<27x32x128xf32, #tpu.memory_space<vmem>>, vector<1x32x128xf32>
    %103 = vector.shape_cast %102 : vector<1x32x128xf32> to vector<32x128xf32>
    %104 = arith.mulf %101, %103 : vector<32x128xf32>
    %c10 = arith.constant 10 : index
    %c0_48 = arith.constant 0 : index
    %c0_49 = arith.constant 0 : index
    %105 = vector.load %arg1[%c10, %c0_48, %c0_49] : memref<27x32x128xf32, #tpu.memory_space<vmem>>, vector<1x32x128xf32>
    %106 = vector.shape_cast %105 : vector<1x32x128xf32> to vector<32x128xf32>
    %107 = arith.mulf %100, %106 : vector<32x128xf32>
    %108 = arith.addf %104, %107 : vector<32x128xf32>
    %c120_i32_50 = arith.constant 120 : i32
    %109 = tpu.dynamic_rotate %100 by %c120_i32_50 dim 1 : vector<32x128xf32>, i32 -> vector<32x128xf32>
    %c11 = arith.constant 11 : index
    %c0_51 = arith.constant 0 : index
    %c0_52 = arith.constant 0 : index
    %110 = vector.load %arg1[%c11, %c0_51, %c0_52] : memref<27x32x128xf32, #tpu.memory_space<vmem>>, vector<1x32x128xf32>
    %111 = vector.shape_cast %110 : vector<1x32x128xf32> to vector<32x128xf32>
    %112 = arith.mulf %109, %111 : vector<32x128xf32>
    %113 = arith.addf %108, %112 : vector<32x128xf32>
    %c8_i32_53 = arith.constant 8 : i32
    %114 = tpu.dynamic_rotate %99 by %c8_i32_53 dim 1 : vector<32x128xf32>, i32 -> vector<32x128xf32>
    %c12 = arith.constant 12 : index
    %c0_54 = arith.constant 0 : index
    %c0_55 = arith.constant 0 : index
    %115 = vector.load %arg1[%c12, %c0_54, %c0_55] : memref<27x32x128xf32, #tpu.memory_space<vmem>>, vector<1x32x128xf32>
    %116 = vector.shape_cast %115 : vector<1x32x128xf32> to vector<32x128xf32>
    %117 = arith.mulf %114, %116 : vector<32x128xf32>
    %118 = arith.addf %113, %117 : vector<32x128xf32>
    %c13 = arith.constant 13 : index
    %c0_56 = arith.constant 0 : index
    %c0_57 = arith.constant 0 : index
    %119 = vector.load %arg1[%c13, %c0_56, %c0_57] : memref<27x32x128xf32, #tpu.memory_space<vmem>>, vector<1x32x128xf32>
    %120 = vector.shape_cast %119 : vector<1x32x128xf32> to vector<32x128xf32>
    %121 = arith.mulf %99, %120 : vector<32x128xf32>
    %122 = arith.addf %118, %121 : vector<32x128xf32>
    %c120_i32_58 = arith.constant 120 : i32
    %123 = tpu.dynamic_rotate %99 by %c120_i32_58 dim 1 : vector<32x128xf32>, i32 -> vector<32x128xf32>
    %c14 = arith.constant 14 : index
    %c0_59 = arith.constant 0 : index
    %c0_60 = arith.constant 0 : index
    %124 = vector.load %arg1[%c14, %c0_59, %c0_60] : memref<27x32x128xf32, #tpu.memory_space<vmem>>, vector<1x32x128xf32>
    %125 = vector.shape_cast %124 : vector<1x32x128xf32> to vector<32x128xf32>
    %126 = arith.mulf %123, %125 : vector<32x128xf32>
    %127 = arith.addf %122, %126 : vector<32x128xf32>
    %c31_i32_61 = arith.constant 31 : i32
    %128 = tpu.dynamic_rotate %99 by %c31_i32_61 dim 0 : vector<32x128xf32>, i32 -> vector<32x128xf32>
    %c8_i32_62 = arith.constant 8 : i32
    %129 = tpu.dynamic_rotate %128 by %c8_i32_62 dim 1 : vector<32x128xf32>, i32 -> vector<32x128xf32>
    %c15 = arith.constant 15 : index
    %c0_63 = arith.constant 0 : index
    %c0_64 = arith.constant 0 : index
    %130 = vector.load %arg1[%c15, %c0_63, %c0_64] : memref<27x32x128xf32, #tpu.memory_space<vmem>>, vector<1x32x128xf32>
    %131 = vector.shape_cast %130 : vector<1x32x128xf32> to vector<32x128xf32>
    %132 = arith.mulf %129, %131 : vector<32x128xf32>
    %133 = arith.addf %127, %132 : vector<32x128xf32>
    %c16 = arith.constant 16 : index
    %c0_65 = arith.constant 0 : index
    %c0_66 = arith.constant 0 : index
    %134 = vector.load %arg1[%c16, %c0_65, %c0_66] : memref<27x32x128xf32, #tpu.memory_space<vmem>>, vector<1x32x128xf32>
    %135 = vector.shape_cast %134 : vector<1x32x128xf32> to vector<32x128xf32>
    %136 = arith.mulf %128, %135 : vector<32x128xf32>
    %137 = arith.addf %133, %136 : vector<32x128xf32>
    %c120_i32_67 = arith.constant 120 : i32
    %138 = tpu.dynamic_rotate %128 by %c120_i32_67 dim 1 : vector<32x128xf32>, i32 -> vector<32x128xf32>
    %c17 = arith.constant 17 : index
    %c0_68 = arith.constant 0 : index
    %c0_69 = arith.constant 0 : index
    %139 = vector.load %arg1[%c17, %c0_68, %c0_69] : memref<27x32x128xf32, #tpu.memory_space<vmem>>, vector<1x32x128xf32>
    %140 = vector.shape_cast %139 : vector<1x32x128xf32> to vector<32x128xf32>
    %141 = arith.mulf %138, %140 : vector<32x128xf32>
    %142 = arith.addf %137, %141 : vector<32x128xf32>
    %c1_70 = arith.constant 1 : index
    %c0_71 = arith.constant 0 : index
    %c0_72 = arith.constant 0 : index
    %143 = vector.load %arg2[%c1_70, %c0_71, %c0_72] : memref<3x128x128xf32, #tpu.memory_space<vmem>>, vector<1x128x128xf32>
    %144 = vector.shape_cast %143 : vector<1x128x128xf32> to vector<128x128xf32>
    %cst_73 = arith.constant dense<0.000000e+00> : vector<32x128xf32>
    %145 = tpu.matmul %142, %144, %cst_73 {dimension_numbers = #tpu.dot_dimension_numbers<[1], [0], [0], [1], [0, 0, 1, 1], [], []>} : vector<32x128xf32>, vector<128x128xf32>, vector<32x128xf32> -> vector<32x128xf32>
    %cst_74 = arith.constant dense<0.000000e+00> : vector<128xf32>
    %146 = vector.multi_reduction <add>, %145, %cst_74 [0] : vector<32x128xf32> to vector<128xf32>
    %147 = vector.shape_cast %146 : vector<128xf32> to vector<1x128xf32>
    %148 = arith.mulf %145, %145 : vector<32x128xf32>
    %cst_75 = arith.constant dense<0.000000e+00> : vector<128xf32>
    %149 = vector.multi_reduction <add>, %148, %cst_75 [0] : vector<32x128xf32> to vector<128xf32>
    %150 = vector.shape_cast %149 : vector<128xf32> to vector<1x128xf32>
    %c0_i32_76 = arith.constant 0 : i32
    %151 = vector.broadcast %c0_i32_76 : i32 to vector<2x128xi32>
    %152 = arith.cmpi eq, %2, %151 : vector<2x128xi32>
    %153 = vector.shape_cast %147 : vector<1x128xf32> to vector<1x128xf32>
    %154 = vector.broadcast %153 : vector<1x128xf32> to vector<2x128xf32>
    %155 = vector.shape_cast %150 : vector<1x128xf32> to vector<1x128xf32>
    %156 = vector.broadcast %155 : vector<1x128xf32> to vector<2x128xf32>
    %157 = arith.select %152, %154, %156 : vector<2x128xi1>, vector<2x128xf32>
    %cst_77 = arith.constant dense<0.000000e+00> : vector<2x8xf32>
    %158 = tpu.matmul %157, %0, %cst_77 {dimension_numbers = #tpu.dot_dimension_numbers<[1], [0], [0], [1], [0, 0, 1, 1], [], []>} : vector<2x128xf32>, vector<128x8xf32>, vector<2x8xf32> -> vector<2x8xf32>
    %cst_78 = arith.constant 0.001953125 : f32
    %159 = vector.broadcast %cst_78 : f32 to vector<2x8xf32>
    %160 = arith.mulf %158, %159 : vector<2x8xf32>
    %161 = vector.extract_strided_slice %160 {offsets = [0, 0], sizes = [1, 8], strides = [1, 1]} : vector<2x8xf32> to vector<1x8xf32>
    %162 = vector.extract_strided_slice %160 {offsets = [1, 0], sizes = [1, 8], strides = [1, 1]} : vector<2x8xf32> to vector<1x8xf32>
    %163 = arith.mulf %161, %161 : vector<1x8xf32>
    %164 = arith.subf %162, %163 : vector<1x8xf32>
    %cst_79 = arith.constant 0.000000e+00 : f32
    %165 = vector.broadcast %cst_79 : f32 to vector<1x8xf32>
    %166 = arith.maximumf %164, %165 : vector<1x8xf32>
    %c1_80 = arith.constant 1 : index
    %c0_81 = arith.constant 0 : index
    %c0_82 = arith.constant 0 : index
    %167 = vector.load %arg5[%c1_80, %c0_81, %c0_82] : memref<3x2x8xf32, #tpu.memory_space<vmem>>, vector<1x2x8xf32>
    %168 = vector.shape_cast %167 : vector<1x2x8xf32> to vector<2x8xf32>
    %169 = vector.extract_strided_slice %168 {offsets = [0, 0], sizes = [1, 8], strides = [1, 1]} : vector<2x8xf32> to vector<1x8xf32>
    %cst_83 = arith.constant 9.99999974E-6 : f32
    %170 = vector.broadcast %cst_83 : f32 to vector<1x8xf32>
    %171 = arith.addf %166, %170 : vector<1x8xf32>
    %172 = math.rsqrt %171 : vector<1x8xf32>
    %173 = arith.mulf %169, %172 : vector<1x8xf32>
    %174 = vector.extract_strided_slice %168 {offsets = [1, 0], sizes = [1, 8], strides = [1, 1]} : vector<2x8xf32> to vector<1x8xf32>
    %175 = arith.mulf %161, %173 : vector<1x8xf32>
    %176 = arith.subf %174, %175 : vector<1x8xf32>
    %c0_i32_84 = arith.constant 0 : i32
    %177 = vector.broadcast %c0_i32_84 : i32 to vector<2x8xi32>
    %178 = arith.cmpi eq, %3, %177 : vector<2x8xi32>
    %179 = vector.shape_cast %173 : vector<1x8xf32> to vector<1x8xf32>
    %180 = vector.broadcast %179 : vector<1x8xf32> to vector<2x8xf32>
    %181 = vector.shape_cast %176 : vector<1x8xf32> to vector<1x8xf32>
    %182 = vector.broadcast %181 : vector<1x8xf32> to vector<2x8xf32>
    %183 = arith.select %178, %180, %182 : vector<2x8xi1>, vector<2x8xf32>
    %cst_85 = arith.constant dense<0.000000e+00> : vector<2x128xf32>
    %184 = tpu.matmul %183, %1, %cst_85 {dimension_numbers = #tpu.dot_dimension_numbers<[1], [0], [0], [1], [0, 0, 1, 1], [], []>} : vector<2x8xf32>, vector<8x128xf32>, vector<2x128xf32> -> vector<2x128xf32>
    %185 = vector.extract_strided_slice %184 {offsets = [0, 0], sizes = [1, 128], strides = [1, 1]} : vector<2x128xf32> to vector<1x128xf32>
    %186 = vector.broadcast %185 : vector<1x128xf32> to vector<32x128xf32>
    %187 = arith.mulf %145, %186 : vector<32x128xf32>
    %188 = vector.extract_strided_slice %184 {offsets = [1, 0], sizes = [1, 128], strides = [1, 1]} : vector<2x128xf32> to vector<1x128xf32>
    %189 = vector.broadcast %188 : vector<1x128xf32> to vector<32x128xf32>
    %190 = arith.addf %187, %189 : vector<32x128xf32>
    %cst_86 = arith.constant 0.000000e+00 : f32
    %191 = vector.broadcast %cst_86 : f32 to vector<32x128xf32>
    %192 = arith.maximumf %190, %191 : vector<32x128xf32>
    %c1_i32_87 = arith.constant 1 : i32
    %193 = tpu.dynamic_rotate %192 by %c1_i32_87 dim 0 : vector<32x128xf32>, i32 -> vector<32x128xf32>
    %c8_i32_88 = arith.constant 8 : i32
    %194 = tpu.dynamic_rotate %193 by %c8_i32_88 dim 1 : vector<32x128xf32>, i32 -> vector<32x128xf32>
    %c18 = arith.constant 18 : index
    %c0_89 = arith.constant 0 : index
    %c0_90 = arith.constant 0 : index
    %195 = vector.load %arg1[%c18, %c0_89, %c0_90] : memref<27x32x128xf32, #tpu.memory_space<vmem>>, vector<1x32x128xf32>
    %196 = vector.shape_cast %195 : vector<1x32x128xf32> to vector<32x128xf32>
    %197 = arith.mulf %194, %196 : vector<32x128xf32>
    %c19 = arith.constant 19 : index
    %c0_91 = arith.constant 0 : index
    %c0_92 = arith.constant 0 : index
    %198 = vector.load %arg1[%c19, %c0_91, %c0_92] : memref<27x32x128xf32, #tpu.memory_space<vmem>>, vector<1x32x128xf32>
    %199 = vector.shape_cast %198 : vector<1x32x128xf32> to vector<32x128xf32>
    %200 = arith.mulf %193, %199 : vector<32x128xf32>
    %201 = arith.addf %197, %200 : vector<32x128xf32>
    %c120_i32_93 = arith.constant 120 : i32
    %202 = tpu.dynamic_rotate %193 by %c120_i32_93 dim 1 : vector<32x128xf32>, i32 -> vector<32x128xf32>
    %c20 = arith.constant 20 : index
    %c0_94 = arith.constant 0 : index
    %c0_95 = arith.constant 0 : index
    %203 = vector.load %arg1[%c20, %c0_94, %c0_95] : memref<27x32x128xf32, #tpu.memory_space<vmem>>, vector<1x32x128xf32>
    %204 = vector.shape_cast %203 : vector<1x32x128xf32> to vector<32x128xf32>
    %205 = arith.mulf %202, %204 : vector<32x128xf32>
    %206 = arith.addf %201, %205 : vector<32x128xf32>
    %c8_i32_96 = arith.constant 8 : i32
    %207 = tpu.dynamic_rotate %192 by %c8_i32_96 dim 1 : vector<32x128xf32>, i32 -> vector<32x128xf32>
    %c21 = arith.constant 21 : index
    %c0_97 = arith.constant 0 : index
    %c0_98 = arith.constant 0 : index
    %208 = vector.load %arg1[%c21, %c0_97, %c0_98] : memref<27x32x128xf32, #tpu.memory_space<vmem>>, vector<1x32x128xf32>
    %209 = vector.shape_cast %208 : vector<1x32x128xf32> to vector<32x128xf32>
    %210 = arith.mulf %207, %209 : vector<32x128xf32>
    %211 = arith.addf %206, %210 : vector<32x128xf32>
    %c22 = arith.constant 22 : index
    %c0_99 = arith.constant 0 : index
    %c0_100 = arith.constant 0 : index
    %212 = vector.load %arg1[%c22, %c0_99, %c0_100] : memref<27x32x128xf32, #tpu.memory_space<vmem>>, vector<1x32x128xf32>
    %213 = vector.shape_cast %212 : vector<1x32x128xf32> to vector<32x128xf32>
    %214 = arith.mulf %192, %213 : vector<32x128xf32>
    %215 = arith.addf %211, %214 : vector<32x128xf32>
    %c120_i32_101 = arith.constant 120 : i32
    %216 = tpu.dynamic_rotate %192 by %c120_i32_101 dim 1 : vector<32x128xf32>, i32 -> vector<32x128xf32>
    %c23 = arith.constant 23 : index
    %c0_102 = arith.constant 0 : index
    %c0_103 = arith.constant 0 : index
    %217 = vector.load %arg1[%c23, %c0_102, %c0_103] : memref<27x32x128xf32, #tpu.memory_space<vmem>>, vector<1x32x128xf32>
    %218 = vector.shape_cast %217 : vector<1x32x128xf32> to vector<32x128xf32>
    %219 = arith.mulf %216, %218 : vector<32x128xf32>
    %220 = arith.addf %215, %219 : vector<32x128xf32>
    %c31_i32_104 = arith.constant 31 : i32
    %221 = tpu.dynamic_rotate %192 by %c31_i32_104 dim 0 : vector<32x128xf32>, i32 -> vector<32x128xf32>
    %c8_i32_105 = arith.constant 8 : i32
    %222 = tpu.dynamic_rotate %221 by %c8_i32_105 dim 1 : vector<32x128xf32>, i32 -> vector<32x128xf32>
    %c24 = arith.constant 24 : index
    %c0_106 = arith.constant 0 : index
    %c0_107 = arith.constant 0 : index
    %223 = vector.load %arg1[%c24, %c0_106, %c0_107] : memref<27x32x128xf32, #tpu.memory_space<vmem>>, vector<1x32x128xf32>
    %224 = vector.shape_cast %223 : vector<1x32x128xf32> to vector<32x128xf32>
    %225 = arith.mulf %222, %224 : vector<32x128xf32>
    %226 = arith.addf %220, %225 : vector<32x128xf32>
    %c25 = arith.constant 25 : index
    %c0_108 = arith.constant 0 : index
    %c0_109 = arith.constant 0 : index
    %227 = vector.load %arg1[%c25, %c0_108, %c0_109] : memref<27x32x128xf32, #tpu.memory_space<vmem>>, vector<1x32x128xf32>
    %228 = vector.shape_cast %227 : vector<1x32x128xf32> to vector<32x128xf32>
    %229 = arith.mulf %221, %228 : vector<32x128xf32>
    %230 = arith.addf %226, %229 : vector<32x128xf32>
    %c120_i32_110 = arith.constant 120 : i32
    %231 = tpu.dynamic_rotate %221 by %c120_i32_110 dim 1 : vector<32x128xf32>, i32 -> vector<32x128xf32>
    %c26 = arith.constant 26 : index
    %c0_111 = arith.constant 0 : index
    %c0_112 = arith.constant 0 : index
    %232 = vector.load %arg1[%c26, %c0_111, %c0_112] : memref<27x32x128xf32, #tpu.memory_space<vmem>>, vector<1x32x128xf32>
    %233 = vector.shape_cast %232 : vector<1x32x128xf32> to vector<32x128xf32>
    %234 = arith.mulf %231, %233 : vector<32x128xf32>
    %235 = arith.addf %230, %234 : vector<32x128xf32>
    %c2_113 = arith.constant 2 : index
    %c0_114 = arith.constant 0 : index
    %c0_115 = arith.constant 0 : index
    %236 = vector.load %arg2[%c2_113, %c0_114, %c0_115] : memref<3x128x128xf32, #tpu.memory_space<vmem>>, vector<1x128x128xf32>
    %237 = vector.shape_cast %236 : vector<1x128x128xf32> to vector<128x128xf32>
    %cst_116 = arith.constant dense<0.000000e+00> : vector<32x128xf32>
    %238 = tpu.matmul %235, %237, %cst_116 {dimension_numbers = #tpu.dot_dimension_numbers<[1], [0], [0], [1], [0, 0, 1, 1], [], []>} : vector<32x128xf32>, vector<128x128xf32>, vector<32x128xf32> -> vector<32x128xf32>
    %cst_117 = arith.constant dense<0.000000e+00> : vector<128xf32>
    %239 = vector.multi_reduction <add>, %238, %cst_117 [0] : vector<32x128xf32> to vector<128xf32>
    %240 = vector.shape_cast %239 : vector<128xf32> to vector<1x128xf32>
    %241 = arith.mulf %238, %238 : vector<32x128xf32>
    %cst_118 = arith.constant dense<0.000000e+00> : vector<128xf32>
    %242 = vector.multi_reduction <add>, %241, %cst_118 [0] : vector<32x128xf32> to vector<128xf32>
    %243 = vector.shape_cast %242 : vector<128xf32> to vector<1x128xf32>
    %c0_i32_119 = arith.constant 0 : i32
    %244 = vector.broadcast %c0_i32_119 : i32 to vector<2x128xi32>
    %245 = arith.cmpi eq, %2, %244 : vector<2x128xi32>
    %246 = vector.shape_cast %240 : vector<1x128xf32> to vector<1x128xf32>
    %247 = vector.broadcast %246 : vector<1x128xf32> to vector<2x128xf32>
    %248 = vector.shape_cast %243 : vector<1x128xf32> to vector<1x128xf32>
    %249 = vector.broadcast %248 : vector<1x128xf32> to vector<2x128xf32>
    %250 = arith.select %245, %247, %249 : vector<2x128xi1>, vector<2x128xf32>
    %cst_120 = arith.constant dense<0.000000e+00> : vector<2x8xf32>
    %251 = tpu.matmul %250, %0, %cst_120 {dimension_numbers = #tpu.dot_dimension_numbers<[1], [0], [0], [1], [0, 0, 1, 1], [], []>} : vector<2x128xf32>, vector<128x8xf32>, vector<2x8xf32> -> vector<2x8xf32>
    %cst_121 = arith.constant 0.001953125 : f32
    %252 = vector.broadcast %cst_121 : f32 to vector<2x8xf32>
    %253 = arith.mulf %251, %252 : vector<2x8xf32>
    %254 = vector.extract_strided_slice %253 {offsets = [0, 0], sizes = [1, 8], strides = [1, 1]} : vector<2x8xf32> to vector<1x8xf32>
    %255 = vector.extract_strided_slice %253 {offsets = [1, 0], sizes = [1, 8], strides = [1, 1]} : vector<2x8xf32> to vector<1x8xf32>
    %256 = arith.mulf %254, %254 : vector<1x8xf32>
    %257 = arith.subf %255, %256 : vector<1x8xf32>
    %cst_122 = arith.constant 0.000000e+00 : f32
    %258 = vector.broadcast %cst_122 : f32 to vector<1x8xf32>
    %259 = arith.maximumf %257, %258 : vector<1x8xf32>
    %c2_123 = arith.constant 2 : index
    %c0_124 = arith.constant 0 : index
    %c0_125 = arith.constant 0 : index
    %260 = vector.load %arg5[%c2_123, %c0_124, %c0_125] : memref<3x2x8xf32, #tpu.memory_space<vmem>>, vector<1x2x8xf32>
    %261 = vector.shape_cast %260 : vector<1x2x8xf32> to vector<2x8xf32>
    %262 = vector.extract_strided_slice %261 {offsets = [0, 0], sizes = [1, 8], strides = [1, 1]} : vector<2x8xf32> to vector<1x8xf32>
    %cst_126 = arith.constant 9.99999974E-6 : f32
    %263 = vector.broadcast %cst_126 : f32 to vector<1x8xf32>
    %264 = arith.addf %259, %263 : vector<1x8xf32>
    %265 = math.rsqrt %264 : vector<1x8xf32>
    %266 = arith.mulf %262, %265 : vector<1x8xf32>
    %267 = vector.extract_strided_slice %261 {offsets = [1, 0], sizes = [1, 8], strides = [1, 1]} : vector<2x8xf32> to vector<1x8xf32>
    %268 = arith.mulf %254, %266 : vector<1x8xf32>
    %269 = arith.subf %267, %268 : vector<1x8xf32>
    %c0_i32_127 = arith.constant 0 : i32
    %270 = vector.broadcast %c0_i32_127 : i32 to vector<2x8xi32>
    %271 = arith.cmpi eq, %3, %270 : vector<2x8xi32>
    %272 = vector.shape_cast %266 : vector<1x8xf32> to vector<1x8xf32>
    %273 = vector.broadcast %272 : vector<1x8xf32> to vector<2x8xf32>
    %274 = vector.shape_cast %269 : vector<1x8xf32> to vector<1x8xf32>
    %275 = vector.broadcast %274 : vector<1x8xf32> to vector<2x8xf32>
    %276 = arith.select %271, %273, %275 : vector<2x8xi1>, vector<2x8xf32>
    %cst_128 = arith.constant dense<0.000000e+00> : vector<2x128xf32>
    %277 = tpu.matmul %276, %1, %cst_128 {dimension_numbers = #tpu.dot_dimension_numbers<[1], [0], [0], [1], [0, 0, 1, 1], [], []>} : vector<2x8xf32>, vector<8x128xf32>, vector<2x128xf32> -> vector<2x128xf32>
    %278 = vector.extract_strided_slice %277 {offsets = [0, 0], sizes = [1, 128], strides = [1, 1]} : vector<2x128xf32> to vector<1x128xf32>
    %279 = vector.broadcast %278 : vector<1x128xf32> to vector<32x128xf32>
    %280 = arith.mulf %238, %279 : vector<32x128xf32>
    %281 = vector.extract_strided_slice %277 {offsets = [1, 0], sizes = [1, 128], strides = [1, 1]} : vector<2x128xf32> to vector<1x128xf32>
    %282 = vector.broadcast %281 : vector<1x128xf32> to vector<32x128xf32>
    %283 = arith.addf %280, %282 : vector<32x128xf32>
    %c0_129 = arith.constant 0 : index
    %c0_130 = arith.constant 0 : index
    %284 = vector.load %arg6[%c0_129, %c0_130] : memref<32x128xf32, #tpu.memory_space<vmem>>, vector<32x128xf32>
    tpu.vector_store %arg6[%c0_129, %c0_130], %283 {strides = array<i32>} : memref<32x128xf32, #tpu.memory_space<vmem>>, vector<32x128xf32>,
    return
  }
}

</mosaic_0001>

<bundles_post_ra>
// kernel: _midle_block_forward_packed.1
= control target key start
LH: loop header
LB: loop body
LE: loop exit
PB: predicated region body
PF: predicated region fallthrough
CT: control target
= control target key end

     0   :  { %11 = vsyncpa [#allocation3], 0  ;;  %s2218_s21 = smov [#allocation2]   ;;  %s3195_s0 = inlined_call_operand.vmem [shape: f32[32,128], index: 0, kind: input, shape index: {}, may-alias: {0,6}]   ;;  %s3196_s1 = inlined_call_operand.vmem [shape: f32[27,32,128], index: 1, kind: input, shape index: {}]   ;;  %s3197_s2 = inlined_call_operand.hbm [shape: f32[3,128,128], index: 2, kind: input, shape index: {}]   ;;  %s3198_s3 = inlined_call_operand.vmem [shape: f32[128,8], index: 3, kind: input, shape index: {}]   ;;  %s3199_s4 = inlined_call_operand.vmem [shape: f32[8,128], index: 4, kind: input, shape index: {}]   ;;  %s3200_s5 = inlined_call_operand.vmem [shape: f32[3,2,8], index: 5, kind: input, shape index: {}]   ;;  %s3201_s6 = inlined_call_operand.vmem [shape: f32[32,128], index: 6, kind: output, shape index: {}, may-alias: {0,6}]  }
   0x1   :  { %s21_s22 = sshll.u32 %s2218_s21, 4  ;;  %s2194_s25 = scalar_lea.hbm %s3197_s2, 6144  ;;  %s22_s22 = int_to_ptr.vmem [resolvable:$true] %s21_s22 }
   0x2   :  { %p2195_p0 = scmp.ne.s32.totalorder %s3197_s2, %s2194_s25  ;;  %p2198_p1 = scmp.lt.u32.totalorder %s2194_s25, %s3197_s2 }
   0x4   :  { %p2200_p2 = pnand %p2198_p1, %p2195_p0 }
   0x6   :  { %2203 = shalt.err (!%p2200_p2)
}
   0x7   :  { %s2204_s30 = scalar_lea.vmem %s22_s22, 6144  ;;  %p2209_p4 = scmp.lt.s32.totalorder %s22_s22, %s22_s22 }
   0x8   :  { %p2205_p3 = scmp.ne.s32.totalorder %s22_s22, %s2204_s30  ;;  %p2210_p5 = scmp.lt.s32.totalorder %s2204_s30, %s2204_s30 }
   0xa   :  { %p2211_p6 = por %p2210_p5, %p2209_p4 }
   0xc   :  { %p2212_p7 = pnand %p2211_p6, %p2205_p3 }
   0xe   :  { %2215 = shalt.err (!%p2212_p7)
}
   0xf   :  { %s2219_s7 = smov 128   ;;  %s2220_s8 = smov 8  }
  0x10   :  { %27 = dma.hbm_to_vmem [thread:$0]  %s3197_s2, 6144, %s22_s22, [#allocation3], %s2219_s7, %s2219_s7, %s2220_s8  }
  0x11   :  { %2216 = dma.done.wait [#allocation3], 6144  }
  0x12   :  { %2217 = vsyncadd [#allocation3], 4294961152  ;;  %v54_v0 = vlaneseq  ;;  %v56_v2 = vld [vmem:[%s3195_s0] sm:$0xff]  ;;  %v59_v3 = vld [vmem:[%s3195_s0 + $0x18] sm:$0xff]  ;;  %v2222_v52 = vmov 0.0|0.0   ;;  %vm2223_vm2 = vmmov 0  }
  0x13   :  { %v2281_v4 = vmax.f32 %v56_v2, 0.0  ;;  %v2283_v5 = vmax.f32 %v59_v3, 0.0  ;;  %v57_v6 = vld [vmem:[%s3195_s0 + $0x8] sm:$0xff]  ;;  %v58_v7 = vld [vmem:[%s3195_s0 + $0x10] sm:$0xff]  ;;  %v242_v14 = vld [vmem:[#allocation2] sm:$0xff]  ;;  %s2221_s0 = smov 120   ;;  %2044 = vmatprep.subr.bf16.mxu1 %v2222_v52 }
  0x14   :  { %v2273_v1 = vshrl.u32 %v54_v0, 7  ;;  %v2292_v8 = vmax.f32 %v57_v6, 0.0  ;;  %v2298_v11 = vmax.f32 %v58_v7, 0.0  ;;  %v243_v17 = vld [vmem:[#allocation2 + $0x8] sm:$0xff]  ;;  %v244_v18 = vld [vmem:[#allocation2 + $0x10] sm:$0xff]  ;;  %v245_v19 = vld [vmem:[#allocation2 + $0x18] sm:$0xff] }
  0x15   :  { %123 = vrot.lane.b32.xlu1 %v2281_v4, %s2220_s8  ;;  %v64_v9 = vrot.slane %v2281_v4, 7  ;;  %v67_v10 = vrot.slane %v2283_v5, 7  ;;  %v2012_v20 = vpack.c.bf16 %v243_v17, %v242_v14  ;;  %v2016_v21 = vpack.c.bf16 %v245_v19, %v244_v18  ;;  %v246_v22 = vld [vmem:[#allocation2 + $0x20] sm:$0xff]  ;;  %v247_v23 = vld [vmem:[#allocation2 + $0x28] sm:$0xff]  ;;  %v248_v26 = vld [vmem:[#allocation2 + $0x30] sm:$0xff] }
  0x16   :  { %vm68_vm0 = vcmp.lt.s32.totalorder %v2273_v1, 1  ;;  %v65_v12 = vrot.slane %v2292_v8, 7  ;;  %v66_v16 = vrot.slane %v2298_v11, 7  ;;  %v2020_v25 = vpack.c.bf16 %v247_v23, %v246_v22  ;;  %v249_v27 = vld [vmem:[#allocation2 + $0x38] sm:$0xff]  ;;  %v250_v30 = vld [vmem:[#allocation2 + $0x40] sm:$0xff]  ;;  %v251_v31 = vld [vmem:[#allocation2 + $0x48] sm:$0xff] }
  0x17   :  { %v2303_v13 = vsel %vm68_vm0, %v67_v10, %v64_v9  ;;  %2013 = vmatprep.subr.bf16.mxu0 %v2012_v20  ;;  %v2024_v29 = vpack.c.bf16 %v249_v27, %v248_v26  ;;  %v2028_v32 = vpack.c.bf16 %v251_v31, %v250_v30  ;;  %v252_v33 = vld [vmem:[#allocation2 + $0x50] sm:$0xff]  ;;  %v253_v34 = vld [vmem:[#allocation2 + $0x58] sm:$0xff]  ;;  %v179_v35 = vrot.slane %v2292_v8, 1  ;;  %v254_v38 = vld [vmem:[#allocation2 + $0x60] sm:$0xff] }
  0x18   :  { %73 = vrot.lane.b32.xlu0 %v2303_v13, %s2220_s8  ;;  %v2311_v15 = vsel %vm68_vm0, %v64_v9, %v65_v12  ;;  %v2320_v24 = vsel %vm68_vm0, %v65_v12, %v66_v16  ;;  %2015 = vmatpush3.bf16.msra.mxu0 %v2012_v20  ;;  %v2328_v28 = vsel %vm68_vm0, %v66_v16, %v67_v10  ;;  %v180_v36 = vrot.slane %v2298_v11, 1  ;;  %v255_v39 = vld [vmem:[#allocation2 + $0x68] sm:$0xff]  ;;  %v256_v43 = vld [vmem:[#allocation2 + $0x70] sm:$0xff]  ;;  %v257_v44 = vld [vmem:[#allocation2 + $0x78] sm:$0xff] }
  0x19   :  { %125 = vrot.lane.b32.xlu1 %v2292_v8, %s2220_s8  ;;  %2017 = vmatprep.subr.bf16.mxu0 %v2016_v21  ;;  %vm182_vm1 = vcmp.lt.s32.totalorder %v2273_v1, 7  ;;  %v2032_v37 = vpack.c.bf16 %v253_v34, %v252_v33  ;;  %v178_v40 = vrot.slane %v2281_v4, 1  ;;  %v2036_v42 = vpack.c.bf16 %v255_v39, %v254_v38  ;;  %v37_v49 = vld [vmem:[%s3198_s3] sm:$0xff]  ;;  %v38_v50 = vld [vmem:[%s3198_s3 + $0x8] sm:$0xff]  ;;  %v1555_v33 = vld [vmem:[%s3196_s1 + $0x38] sm:$0xff] }
  0x1a   :  { %v2348_v41 = vsel %vm182_vm1, %v179_v35, %v180_v36  ;;  %v2040_v46 = vpack.c.bf16 %v257_v44, %v256_v43  ;;  %v181_v47 = vrot.slane %v2283_v5, 1  ;;  %v2386_v53 = vpack.c.bf16 %v38_v50, %v37_v49  ;;  %v1552_v55 = vld [vmem:[%s3196_s1 + $0x20] sm:$0xff]  ;;  %v1553_v61 = vld [vmem:[%s3196_s1 + $0x28] sm:$0xff] }
  0x1b   :  { %v2356_v45 = vsel %vm182_vm1, %v178_v40, %v179_v35  ;;  %v81_v56 = vld [vmem:[%s3196_s1] sm:$0xff]  ;;  %v94_v59 = vmul.f32 %v1552_v55, %v2303_v13  ;;  %v82_v62 = vld [vmem:[%s3196_s1 + $0x8] sm:$0xff]  ;;  %v95_v7 = vmul.f32 %v1553_v61, %v2311_v15  ;;  %v84_v35 = vld [vmem:[%s3196_s1 + $0x18] sm:$0xff]  ;;  %vm365_vm3 = vcmp.eq.s32.totalorder %v2273_v1, 0 }
  0x1c   :  { %75 = vrot.lane.b32.xlu0 %v2311_v15, %s2220_s8  ;;  %2019 = vmatpush3.bf16.msra.mxu0 %v2016_v21  ;;  %v2369_v48 = vsel %vm182_vm1, %v180_v36, %v181_v47  ;;  %v2383_v51 = vsel %vm182_vm1, %v181_v47, %v178_v40  ;;  %v1556_v63 = vld [vmem:[%s3196_s1 + $0x40] sm:$0xff]  ;;  %v1561_v19 = vld [vmem:[%s3196_s1 + $0x68] sm:$0xff]  ;;  %v1558_v36 = vld [vmem:[%s3196_s1 + $0x50] sm:$0xff]  ;;  %vm465_vm4 = vcmask 64512  }
  0x1d   :  { %102 = vrot.lane.b32.xlu1 %v2303_v13, %s2221_s0  ;;  %2021 = vmatprep.subr.bf16.mxu0 %v2020_v25  ;;  %v1560_v2 = vld [vmem:[%s3196_s1 + $0x60] sm:$0xff]  ;;  %v1557_v13 = vld [vmem:[%s3196_s1 + $0x48] sm:$0xff]  ;;  %v1559_v47 = vld [vmem:[%s3196_s1 + $0x58] sm:$0xff] }
  0x1e   :  { %2046 = vmatpush3.bf16.msra.mxu1 %v2386_v53  ;;  %v1564_v6 = vld [vmem:[%s3196_s1 + $0x80] sm:$0xff] }
  0x1f   :  { %2047 = vmatprep.subr.bf16.mxu1 %v2222_v52  ;;  %v149_v18 = vmul.f32 %v1564_v6, %v2281_v4  ;;  %v1568_v61 = vld [vmem:[%s3196_s1 + $0xa0] sm:$0xff] }
  0x20   :  { %77 = vrot.lane.b32.xlu0 %v2320_v24, %s2220_s8  ;;  %2023 = vmatpush3.bf16.msra.mxu0 %v2020_v25  ;;  %v1554_v25 = vld [vmem:[%s3196_s1 + $0x30] sm:$0xff] }
  0x21   :  { %104 = vrot.lane.b32.xlu1 %v2311_v15, %s2221_s0  ;;  %2025 = vmatprep.subr.bf16.mxu0 %v2024_v29  ;;  %v1565_v15 = vld [vmem:[%s3196_s1 + $0x88] sm:$0xff] }
  0x22   :  { %v150_v31 = vmul.f32 %v1565_v15, %v2292_v8 }
  0x24   :  { %79 = vrot.lane.b32.xlu0 %v2328_v28, %s2220_s8  ;;  %2027 = vmatpush3.bf16.msra.mxu0 %v2024_v29 }
  0x25   :  { %108 = vrot.lane.b32.xlu1 %v2328_v28, %s2221_s0  ;;  %2029 = vmatprep.subr.bf16.mxu0 %v2028_v32 }
  0x28   :  { %106 = vrot.lane.b32.xlu0 %v2320_v24, %s2221_s0  ;;  %2031 = vmatpush3.bf16.msra.mxu0 %v2028_v32 }
  0x29   :  { %157 = vrot.lane.b32.xlu1 %v2281_v4, %s2221_s0  ;;  %2033 = vmatprep.subr.bf16.mxu0 %v2032_v37  ;;  %v83_v4 = vld [vmem:[%s3196_s1 + $0x10] sm:$0xff] }
  0x2c   :  { %127 = vrot.lane.b32.xlu0 %v2298_v11, %s2220_s8  ;;  %2035 = vmatpush3.bf16.msra.mxu0 %v2032_v37  ;;  %v96_v37 = vmul.f32 %v1554_v25, %v2320_v24  ;;  %v1562_v24 = vld [vmem:[%s3196_s1 + $0x70] sm:$0xff] }
  0x2d   :  { %159 = vrot.lane.b32.xlu1 %v2292_v8, %s2221_s0  ;;  %2037 = vmatprep.subr.bf16.mxu0 %v2036_v42  ;;  %v97_v8 = vmul.f32 %v1555_v33, %v2328_v28  ;;  %v1569_v28 = vld [vmem:[%s3196_s1 + $0xa8] sm:$0xff] }
  0x30   :  { %129 = vrot.lane.b32.xlu0 %v2283_v5, %s2220_s8  ;;  %2039 = vmatpush3.bf16.msra.mxu0 %v2036_v42 }
  0x31   :  { %189 = vrot.lane.b32.xlu1 %v2348_v41, %s2220_s8  ;;  %2041 = vmatprep.subr.bf16.mxu0 %v2040_v46 }
  0x34   :  { %187 = vrot.lane.b32.xlu0 %v2356_v45, %s2220_s8  ;;  %2043 = vmatpush3.bf16.msra.mxu0 %v2040_v46  ;;  %v1566_v46 = vld [vmem:[%s3196_s1 + $0x90] sm:$0xff] }
  0x35   :  { %163 = vrot.lane.b32.xlu1 %v2283_v5, %s2221_s0 }
  0x38   :  { %161 = vrot.lane.b32.xlu0 %v2298_v11, %s2221_s0 }
  0x39   :  { %221 = vrot.lane.b32.xlu1 %v2356_v45, %s2221_s0 }
  0x3c   :  { %191 = vrot.lane.b32.xlu0 %v2369_v48, %s2220_s8 }
  0x3d   :  { %223 = vrot.lane.b32.xlu1 %v2348_v41, %s2221_s0 }
  0x40   :  { %193 = vrot.lane.b32.xlu0 %v2383_v51, %s2220_s8 }
  0x41   :  { %227 = vrot.lane.b32.xlu1 %v2383_v51, %s2221_s0 }
  0x44   :  { %225 = vrot.lane.b32.xlu0 %v2369_v48, %s2221_s0 }
  0x87   :  { %v124_v54 = vpop.permute.xlu1 %123 }
  0x88   :  { %v136_v14 = vmul.f32 %v1560_v2, %v124_v54  ;;  %v151_v54 = vmul.f32 %v1566_v46, %v2298_v11  ;;  %v1577_v11 = vld [vmem:[%s3196_s1 + $0xe8] sm:$0xff]  ;;  %v1579_v46 = vld [vmem:[%s3196_s1 + $0xf8] sm:$0xff] }
  0x89   :  { %v1573_v2 = vld [vmem:[%s3196_s1 + $0xc8] sm:$0xff] }
  0x8a   :  { %v74_v57 = vpop.permute.xlu0 %73 }
  0x8b   :  { %v126_v58 = vpop.permute.xlu1 %125  ;;  %v85_v60 = vmul.f32 %v81_v56, %v74_v57 }
  0x8c   :  { %v137_v26 = vmul.f32 %v1561_v19, %v126_v58  ;;  %v1576_v19 = vld [vmem:[%s3196_s1 + $0xe0] sm:$0xff] }
  0x8d   :  { %v98_v9 = vadd.f32 %v94_v59, %v85_v60  ;;  %v1567_v60 = vld [vmem:[%s3196_s1 + $0x98] sm:$0xff] }
  0x8e   :  { %v76_v0 = vpop.permute.xlu0 %75  ;;  %v152_v6 = vmul.f32 %v1567_v60, %v2283_v5 }
  0x8f   :  { %v103_v3 = vpop.permute.xlu1 %102  ;;  %v86_v10 = vmul.f32 %v82_v62, %v76_v0 }
  0x90   :  { %v115_v12 = vmul.f32 %v1556_v63, %v103_v3  ;;  %v1563_v63 = vld [vmem:[%s3196_s1 + $0x78] sm:$0xff] }
  0x91   :  { %v99_v21 = vadd.f32 %v95_v7, %v86_v10 }
  0x92   :  { %v119_v16 = vadd.f32 %v115_v12, %v98_v9  ;;  %v78_v17 = vpop.permute.xlu0 %77 }
  0x93   :  { %v105_v20 = vpop.permute.xlu1 %104  ;;  %v87_v38 = vmul.f32 %v83_v4, %v78_v17 }
  0x94   :  { %v140_v22 = vadd.f32 %v136_v14, %v119_v16  ;;  %v116_v23 = vmul.f32 %v1557_v13, %v105_v20  ;;  %v214_v14 = vmul.f32 %v1577_v11, %v2348_v41  ;;  %v1570_v41 = vld [vmem:[%s3196_s1 + $0xb0] sm:$0xff] }
  0x95   :  { %v100_v49 = vadd.f32 %v96_v37, %v87_v38  ;;  %v1581_v37 = vld [vmem:[%s3196_s1 + $0x108] sm:$0xff] }
  0x96   :  { %v120_v27 = vadd.f32 %v116_v23, %v99_v21  ;;  %v80_v29 = vpop.permute.xlu0 %79  ;;  %v153_v30 = vadd.f32 %v149_v18, %v140_v22  ;;  %v1572_v18 = vld [vmem:[%s3196_s1 + $0xc0] sm:$0xff] }
  0x97   :  { %v109_v32 = vpop.permute.xlu1 %108  ;;  %v88_v42 = vmul.f32 %v84_v35, %v80_v29  ;;  %v1580_v29 = vld [vmem:[%s3196_s1 + $0x100] sm:$0xff] }
  0x98   :  { %v141_v34 = vadd.f32 %v137_v26, %v120_v27  ;;  %v118_v56 = vmul.f32 %v1559_v47, %v109_v32  ;;  %v213_v26 = vmul.f32 %v1576_v19, %v2356_v45  ;;  %v1571_v45 = vld [vmem:[%s3196_s1 + $0xb8] sm:$0xff]  ;;  %v47_v19 = vld [vmem:[%s3198_s3 + $0x50] sm:$0xff] }
  0x99   :  { %v101_v55 = vadd.f32 %v97_v8, %v88_v42 }
  0x9a   :  { %v107_v39 = vpop.permute.xlu0 %106  ;;  %v154_v40 = vadd.f32 %v150_v31, %v141_v34 }
  0x9b   :  { %v117_v43 = vmul.f32 %v1558_v36, %v107_v39  ;;  %v158_v44 = vpop.permute.xlu1 %157  ;;  %v122_v7 = vadd.f32 %v118_v56, %v101_v55  ;;  %v1574_v36 = vld [vmem:[%s3196_s1 + $0xd0] sm:$0xff] }
  0x9c   :  { %v170_v9 = vmul.f32 %v1568_v61, %v158_v44 }
  0x9d   :  { %v121_v57 = vadd.f32 %v117_v43, %v100_v49 }
  0x9e   :  { %v128_v50 = vpop.permute.xlu0 %127  ;;  %v174_v21 = vadd.f32 %v170_v9, %v153_v30  ;;  %v1578_v30 = vld [vmem:[%s3196_s1 + $0xf0] sm:$0xff]  ;;  %v42_v9 = vld [vmem:[%s3198_s3 + $0x28] sm:$0xff] }
  0x9f   :  { %v138_v58 = vmul.f32 %v1562_v24, %v128_v50  ;;  %v160_v59 = vpop.permute.xlu1 %159  ;;  %v1575_v24 = vld [vmem:[%s3196_s1 + $0xd8] sm:$0xff] }
  0xa0   :  { %v171_v62 = vmul.f32 %v1569_v28, %v160_v59  ;;  %v1582_v59 = vld [vmem:[%s3196_s1 + $0x110] sm:$0xff] }
  0xa1   :  { %v142_v0 = vadd.f32 %v138_v58, %v121_v57 }
  0xa2   :  { %v130_v3 = vpop.permute.xlu0 %129  ;;  %v175_v16 = vadd.f32 %v171_v62, %v154_v40  ;;  %v215_v40 = vmul.f32 %v1578_v30, %v2369_v48  ;;  %v1583_v48 = vld [vmem:[%s3196_s1 + $0x118] sm:$0xff] }
  0xa3   :  { %v139_v10 = vmul.f32 %v1563_v63, %v130_v3  ;;  %v190_v12 = vpop.permute.xlu1 %189  ;;  %v155_v13 = vadd.f32 %v151_v54, %v142_v0  ;;  %v216_v54 = vmul.f32 %v1579_v46, %v2383_v51  ;;  %v39_v51 = vld [vmem:[%s3198_s3 + $0x10] sm:$0xff]  ;;  %v40_v3 = vld [vmem:[%s3198_s3 + $0x18] sm:$0xff] }
  0xa4   :  { %v201_v17 = vmul.f32 %v1573_v2, %v190_v12  ;;  %v43_v12 = vld [vmem:[%s3198_s3 + $0x30] sm:$0xff] }
  0xa5   :  { %v143_v20 = vadd.f32 %v139_v10, %v122_v7  ;;  %v41_v7 = vld [vmem:[%s3198_s3 + $0x20] sm:$0xff] }
  0xa6   :  { %v205_v15 = vadd.f32 %v201_v17, %v175_v16  ;;  %v188_v5 = vpop.permute.xlu0 %187  ;;  %v2532_v10 = vpack.c.bf16 %v42_v9, %v41_v7  ;;  %v45_v16 = vld [vmem:[%s3198_s3 + $0x40] sm:$0xff]  ;;  %v46_v17 = vld [vmem:[%s3198_s3 + $0x48] sm:$0xff]  ;;  %v2624_v9 = vsub.s32 0, %v2273_v1 }
  0xa7   :  { %v200_v22 = vmul.f32 %v1572_v18, %v188_v5  ;;  %v164_v23 = vpop.permute.xlu1 %163  ;;  %v156_v25 = vadd.f32 %v152_v6, %v143_v20  ;;  %v2522_v6 = vpack.c.bf16 %v40_v3, %v39_v51  ;;  %v2552_v18 = vpack.c.bf16 %v46_v17, %v45_v16  ;;  %v48_v20 = vld [vmem:[%s3198_s3 + $0x58] sm:$0xff]  ;;  %v49_v5 = vld [vmem:[%s3198_s3 + $0x60] sm:$0xff] }
  0xa8   :  { %v218_v4 = vadd.f32 %v214_v14, %v205_v15  ;;  %v173_v8 = vmul.f32 %v1571_v45, %v164_v23  ;;  %v2562_v15 = vpack.c.bf16 %v48_v20, %v47_v19  ;;  %v51_v23 = vld [vmem:[%s3198_s3 + $0x70] sm:$0xff] }
  0xa9   :  { %v204_v27 = vadd.f32 %v200_v22, %v174_v21  ;;  %2049 = vmatpush3.bf16.msra.mxu1 %v2522_v6  ;;  %v50_v21 = vld [vmem:[%s3198_s3 + $0x68] sm:$0xff] }
  0xaa   :  { %v162_v31 = vpop.permute.xlu0 %161  ;;  %v177_v55 = vadd.f32 %v173_v8, %v156_v25  ;;  %2050 = vmatprep.subr.bf16.mxu1 %v2222_v52  ;;  %v2572_v22 = vpack.c.bf16 %v50_v21, %v49_v5  ;;  %v52_v25 = vld [vmem:[%s3198_s3 + $0x78] sm:$0xff] }
  0xab   :  { %v172_v32 = vmul.f32 %v1570_v41, %v162_v31  ;;  %v222_v33 = vpop.permute.xlu1 %221  ;;  %v217_v34 = vadd.f32 %v213_v26, %v204_v27  ;;  %v2224_v26 = vmov 0.0   ;;  %v2583_v41 = vpack.c.bf16 %v52_v25, %v51_v23 }
  0xac   :  { %v234_v35 = vmul.f32 %v1580_v29, %v222_v33  ;;  %1848 = vmatprep.mubr.msk.f32.mxu1 %vm2223_vm2, %v2224_v26 }
  0xad   :  { %v176_v42 = vadd.f32 %v172_v32, %v155_v13  ;;  %2052 = vmatpush3.bf16.msra.mxu1 %v2532_v10  ;;  %v44_v13 = vld [vmem:[%s3198_s3 + $0x38] sm:$0xff] }
  0xae   :  { %v192_v38 = vpop.permute.xlu0 %191  ;;  %v238_v39 = vadd.f32 %v234_v35, %v217_v34  ;;  %2053 = vmatprep.subr.bf16.mxu1 %v2222_v52  ;;  %v2542_v14 = vpack.c.bf16 %v44_v13, %v43_v12  ;;  %v2627_v12 = vsub.s32 1, %v2273_v1 }
  0xaf   :  { %v202_v43 = vmul.f32 %v1574_v36, %v192_v38  ;;  %v224_v44 = vpop.permute.xlu1 %223 }
  0xb0   :  { %v235_v47 = vmul.f32 %v1581_v37, %v224_v44  ;;  %1810 = vmatprep.mubr.f32.mxu0 %v238_v39 }
  0xb1   :  { %v206_v49 = vadd.f32 %v202_v43, %v176_v42  ;;  %2055 = vmatpush3.bf16.msra.mxu1 %v2542_v14 }
  0xb2   :  { %v239_v28 = vadd.f32 %v235_v47, %v218_v4  ;;  %v194_v50 = vpop.permute.xlu0 %193  ;;  %2056 = vmatprep.subr.bf16.mxu1 %v2222_v52 }
  0xb3   :  { %v203_v56 = vmul.f32 %v1575_v24, %v194_v50  ;;  %v228_v57 = vpop.permute.xlu1 %227  ;;  %v219_v58 = vadd.f32 %v215_v40, %v206_v49 }
  0xb4   :  { %1811 = vmatmul.mubr.f32.vlgmr.msra.gmra.mrb[0].mxu0 %v239_v28  ;;  %v237_v61 = vmul.f32 %v1583_v48, %v228_v57 }
  0xb5   :  { %v207_v60 = vadd.f32 %v203_v56, %v177_v55  ;;  %2058 = vmatpush3.bf16.msra.mxu1 %v2552_v18  ;;  %v2616_v55 = vld [vmem:[%s3199_s4] sm:$0xff] }
  0xb6   :  { %v226_v62 = vpop.permute.xlu0 %225  ;;  %2059 = vmatprep.subr.bf16.mxu1 %v2222_v52 }
  0xb7   :  { %v220_v63 = vadd.f32 %v216_v54, %v207_v60  ;;  %v236_v11 = vmul.f32 %v1582_v59, %v226_v62 }
  0xb9   :  { %v241_v0 = vadd.f32 %v237_v61, %v220_v63  ;;  %v240_v2 = vadd.f32 %v236_v11, %v219_v58  ;;  %2061 = vmatpush3.bf16.msra.mxu1 %v2562_v15 }
  0xba   :  { %2062 = vmatprep.subr.bf16.mxu1 %v2222_v52 }
  0xbb   :  { %1813 = vmatprep.mubr.f32.mxu0 %v240_v2 }
  0xbc   :  { %1814 = vmatmul.mubr.f32.gmra.mrb[2].mxu0 %v241_v0  ;;  %v444_v0 = vld [vmem:[%s3200_s5] sm:$0x3] }
  0xbd   :  { %2064 = vmatpush3.bf16.msra.mxu1 %v2572_v22 }
  0xbe   :  { %2065 = vmatprep.subr.bf16.mxu1 %v2222_v52 }
  0xc1   :  { %2067 = vmatpush3.bf16.msra.mxu1 %v2583_v41 }
  0xc2   :  { %1851 = vmatprep.subr.mxu1 %v2224_v26 }
 0x187   :  { %v2588_v4 = vpop.f32.mrb[0].mxu0 }
 0x188   :  { %v353_v27 = vmul.f32 %v2588_v4, %v2588_v4  ;;  %v2592_v29 = vpop.f32.mrb[1].mxu0 }
 0x189   :  { %v343_v31 = vadd.f32 %v2588_v4, %v2592_v29  ;;  %v352_v32 = vmul.f32 %v2592_v29, %v2592_v29 }
 0x18b   :  { %v356_v33 = vadd.f32 %v353_v27, %v352_v32 }
 0x18f   :  { %v2598_v34 = vpop.f32.mrb[2].mxu0 }
 0x190   :  { %v2600_v30 = vpop.f32.mrb[3].mxu0  ;;  %v355_v36 = vmul.f32 %v2598_v34, %v2598_v34 }
 0x191   :  { %v344_v45 = vadd.f32 %v343_v31, %v2600_v30  ;;  %v354_v35 = vmul.f32 %v2600_v30, %v2600_v30 }
 0x193   :  { %v345_v37 = vadd.f32 %v2598_v34, %v344_v45  ;;  %v357_v38 = vadd.f32 %v356_v33, %v354_v35 }
 0x195   :  { %v346_v39 = vrot.slane %v345_v37, 4  ;;  %v358_v40 = vadd.f32 %v357_v38, %v355_v36 }
 0x197   :  { %v347_v8 = vadd.f32 %v346_v39, %v345_v37  ;;  %v359_v42 = vrot.slane %v358_v40, 4 }
 0x199   :  { %v348_v43 = vrot.slane %v347_v8, 2  ;;  %v360_v44 = vadd.f32 %v359_v42, %v358_v40 }
 0x19b   :  { %v349_v46 = vadd.f32 %v348_v43, %v347_v8  ;;  %v361_v47 = vrot.slane %v360_v44, 2 }
 0x19d   :  { %v350_v24 = vrot.slane %v349_v46, 1  ;;  %v362_v49 = vadd.f32 %v361_v47, %v360_v44 }
 0x19f   :  { %v363_v28 = vrot.slane %v362_v49, 1  ;;  %v351_v50 = vadd.f32 %v350_v24, %v349_v46 }
 0x1a1   :  { %v364_v48 = vadd.f32 %v363_v28, %v362_v49  ;;  %v737_v28 = vld [vmem:[#allocation2 + $0x80] sm:$0xff] }
 0x1a3   :  { %v366_v54 = vsel %vm365_vm3, %v351_v50, %v364_v48  ;;  %v738_v50 = vld [vmem:[#allocation2 + $0x88] sm:$0xff] }
 0x1a4   :  { %1849 = vmatmul.mubr.f32.vlgmr.msra.gmra.mrb[0].mxu1 %v366_v54 }
 0x1a5   :  { %1853 = vmatprep.mubr.msk.f32.mxu1 %vm2223_vm2, %v2224_v26  ;;  %1852 = vmatpush3.msra.mxu1 %v2616_v55 }
 0x1a6   :  { %2100 = vmatprep.subr.bf16.mxu1 %v2222_v52 }
 0x277   :  { %v433_v56 = vpop.f32.mrb[0].mxu1 }
 0x278   :  { %v437_v57 = vmul.f32 0.001953125, %v433_v56  ;;  %v1850_v58 = vpop.f32.mrb[1].mxu1 }
 0x279   :  { %v740_v58 = vld [vmem:[#allocation2 + $0x98] sm:$0xff] }
 0x27a   :  { %v438_v59 = vmul.f32 %v437_v57, %v437_v57 }
 0x27c   :  { %v440_v60 = vrot.slane %v438_v59, 7 }
 0x27e   :  { %v442_v61 = vsub.f32 %v437_v57, %v440_v60  ;;  %v2068_v60 = vpack.c.bf16 %v738_v50, %v737_v28 }
 0x280   :  { %v443_v62 = vmax.f32 %v442_v61, 0.0  ;;  %2069 = vmatprep.subr.bf16.mxu0 %v2068_v60 }
 0x281   :  { %2071 = vmatpush3.bf16.msra.mxu0 %v2068_v60  ;;  %v1586_v60 = vld [vmem:[%s3196_s1 + $0x128] sm:$0xff] }
 0x282   :  { %v445_v63 = vadd.f32 1e-05, %v443_v62  ;;  %v741_v62 = vld [vmem:[#allocation2 + $0xa0] sm:$0xff] }
 0x284   :  { %2187 = vrsqrt.f32 %v445_v63  ;;  %v742_v63 = vld [vmem:[#allocation2 + $0xa8] sm:$0xff] }
 0x28e   :  { %v2188_v11 = vpop.eup %2187 }
 0x28f   :  { %v448_v2 = vrot.slane %v2188_v11, 1  ;;  %v2076_v11 = vpack.c.bf16 %v742_v63, %v741_v62 }
 0x291   :  { %v450_v51 = vmul.f32 %v448_v2, %v444_v0  ;;  %v744_v2 = vld [vmem:[#allocation2 + $0xb8] sm:$0xff] }
 0x293   :  { %v451_v3 = vmul.f32 %v450_v51, %v437_v57  ;;  %v459_v16 = vrot.slane %v450_v51, %v2624_v9  ;;  %v739_v57 = vld [vmem:[#allocation2 + $0x90] sm:$0xff] }
 0x294   :  { %v2072_v61 = vpack.c.bf16 %v740_v58, %v739_v57 }
 0x295   :  { %v453_v7 = vrot.slane %v451_v3, 7  ;;  %v745_v3 = vld [vmem:[#allocation2 + $0xc0] sm:$0xff] }
 0x296   :  { %2073 = vmatprep.subr.bf16.mxu0 %v2072_v61 }
 0x297   :  { %v455_v13 = vsub.f32 %v444_v0, %v453_v7  ;;  %v743_v0 = vld [vmem:[#allocation2 + $0xb0] sm:$0xff]  ;;  %2075 = vmatpush3.bf16.msra.mxu0 %v2072_v61  ;;  %v746_v7 = vld [vmem:[#allocation2 + $0xc8] sm:$0xff]  ;;  %v1601_v61 = vld [vmem:[%s3196_s1 + $0x1a0] sm:$0xff] }
 0x298   :  { %2077 = vmatprep.subr.bf16.mxu0 %v2076_v11  ;;  %v2080_v51 = vpack.c.bf16 %v744_v2, %v743_v0 }
 0x299   :  { %v463_v17 = vrot.slane %v455_v13, %v2627_v12  ;;  %v2084_v13 = vpack.c.bf16 %v746_v7, %v745_v3 }
 0x29b   :  { %v464_v19 = vsel %vm365_vm3, %v459_v16, %v463_v17  ;;  %2079 = vmatpush3.bf16.msra.mxu0 %v2076_v11  ;;  %v747_v16 = vld [vmem:[#allocation2 + $0xd0] sm:$0xff]  ;;  %v748_v17 = vld [vmem:[#allocation2 + $0xd8] sm:$0xff] }
 0x29c   :  { %1854 = vmatmul.mubr.msk.f32.vlgmr.msra.gmra.mrb[2].mxu1 %vm465_vm4, %v464_v19  ;;  %2081 = vmatprep.subr.bf16.mxu0 %v2080_v51  ;;  %v2088_v19 = vpack.c.bf16 %v748_v17, %v747_v16  ;;  %v1594_v16 = vld [vmem:[%s3196_s1 + $0x168] sm:$0xff]  ;;  %v1591_v17 = vld [vmem:[%s3196_s1 + $0x150] sm:$0xff] }
 0x29d   :  { %2102 = vmatpush3.bf16.msra.mxu1 %v2386_v53  ;;  %1926 = vmatprep.mubr.msk.f32.mxu1 %vm2223_vm2, %v2224_v26 }
 0x29e   :  { %2103 = vmatprep.subr.bf16.mxu1 %v2222_v52 }
 0x29f   :  { %2083 = vmatpush3.bf16.msra.mxu0 %v2080_v51  ;;  %v1587_v51 = vld [vmem:[%s3196_s1 + $0x130] sm:$0xff] }
 0x2a0   :  { %2085 = vmatprep.subr.bf16.mxu0 %v2084_v13 }
 0x2a1   :  { %2105 = vmatpush3.bf16.msra.mxu1 %v2522_v6 }
 0x2a2   :  { %2106 = vmatprep.subr.bf16.mxu1 %v2222_v52 }
 0x2a3   :  { %2087 = vmatpush3.bf16.msra.mxu0 %v2084_v13  ;;  %v1588_v13 = vld [vmem:[%s3196_s1 + $0x138] sm:$0xff] }
 0x2a4   :  { %2089 = vmatprep.subr.bf16.mxu0 %v2088_v19 }
 0x2a5   :  { %2108 = vmatpush3.bf16.msra.mxu1 %v2532_v10 }
 0x2a6   :  { %2109 = vmatprep.subr.bf16.mxu1 %v2222_v52 }
 0x2a7   :  { %2091 = vmatpush3.bf16.msra.mxu0 %v2088_v19 }
 0x2a9   :  { %2111 = vmatpush3.bf16.msra.mxu1 %v2542_v14 }
 0x2aa   :  { %2112 = vmatprep.subr.bf16.mxu1 %v2222_v52 }
 0x2ad   :  { %2114 = vmatpush3.bf16.msra.mxu1 %v2552_v18 }
 0x2ae   :  { %2115 = vmatprep.subr.bf16.mxu1 %v2222_v52 }
 0x2b1   :  { %2117 = vmatpush3.bf16.msra.mxu1 %v2562_v15 }
 0x2b2   :  { %2118 = vmatprep.subr.bf16.mxu1 %v2222_v52 }
 0x2b5   :  { %2120 = vmatpush3.bf16.msra.mxu1 %v2572_v22 }
 0x2b6   :  { %2121 = vmatprep.subr.bf16.mxu1 %v2222_v52 }
 0x2b9   :  { %2123 = vmatpush3.bf16.msra.mxu1 %v2583_v41 }
 0x36f   :  { %v535_v20 = vpop.f32.mrb[2].mxu1 }
 0x370   :  { %v542_v5 = vrot.slane %v535_v20, %v2624_v9  ;;  %v1855_v21 = vpop.f32.mrb[3].mxu1  ;;  %v550_v23 = vrot.slane %v535_v20, %v2627_v12  ;;  %v749_v20 = vld [vmem:[#allocation2 + $0xe0] sm:$0xff] }
 0x372   :  { %v543_v25 = vmul.f32 %v542_v5, %v2592_v29  ;;  %v544_v27 = vmul.f32 %v2588_v4, %v542_v5  ;;  %v545_v31 = vmul.f32 %v542_v5, %v2600_v30  ;;  %v546_v32 = vmul.f32 %v2598_v34, %v542_v5  ;;  %v750_v5 = vld [vmem:[#allocation2 + $0xe8] sm:$0xff] }
 0x373   :  { %v2092_v21 = vpack.c.bf16 %v750_v5, %v749_v20  ;;  %v1592_v5 = vld [vmem:[%s3196_s1 + $0x158] sm:$0xff] }
 0x374   :  { %v551_v33 = vadd.f32 %v550_v23, %v543_v25  ;;  %v552_v45 = vadd.f32 %v550_v23, %v544_v27  ;;  %v553_v35 = vadd.f32 %v550_v23, %v545_v31  ;;  %v554_v36 = vadd.f32 %v550_v23, %v546_v32  ;;  %v751_v23 = vld [vmem:[#allocation2 + $0xf0] sm:$0xff]  ;;  %v752_v25 = vld [vmem:[#allocation2 + $0xf8] sm:$0xff] }
 0x375   :  { %2093 = vmatprep.subr.bf16.mxu0 %v2092_v21  ;;  %v2096_v27 = vpack.c.bf16 %v752_v25, %v751_v23 }
 0x376   :  { %v2657_v37 = vmax.f32 %v551_v33, 0.0  ;;  %v2659_v38 = vmax.f32 %v552_v45, 0.0  ;;  %v2661_v39 = vmax.f32 %v553_v35, 0.0  ;;  %v2663_v40 = vmax.f32 %v554_v36, 0.0  ;;  %2095 = vmatpush3.bf16.msra.mxu0 %v2092_v21 }
 0x377   :  { %2097 = vmatprep.subr.bf16.mxu0 %v2096_v27 }
 0x378   :  { %622 = vrot.lane.b32.xlu0 %v2661_v39, %s2220_s8  ;;  %618 = vrot.lane.b32.xlu1 %v2657_v37, %s2220_s8  ;;  %v559_v4 = vrot.slane %v2657_v37, 7  ;;  %v562_v29 = vrot.slane %v2663_v40, 7  ;;  %v560_v34 = vrot.slane %v2659_v38, 7  ;;  %v561_v30 = vrot.slane %v2661_v39, 7 }
 0x379   :  { %v673_v8 = vrot.slane %v2657_v37, 1  ;;  %v674_v42 = vrot.slane %v2659_v38, 1  ;;  %v675_v43 = vrot.slane %v2661_v39, 1  ;;  %v676_v44 = vrot.slane %v2663_v40, 1 }
 0x37a   :  { %v2679_v46 = vsel %vm68_vm0, %v562_v29, %v559_v4  ;;  %v2683_v47 = vsel %vm68_vm0, %v560_v34, %v561_v30  ;;  %v2687_v24 = vsel %vm68_vm0, %v559_v4, %v560_v34  ;;  %v2691_v49 = vsel %vm68_vm0, %v561_v30, %v562_v29  ;;  %2099 = vmatpush3.bf16.msra.mxu0 %v2096_v27  ;;  %v1585_v4 = vld [vmem:[%s3196_s1 + $0x120] sm:$0xff] }
 0x37b   :  { %v2699_v48 = vsel %vm182_vm1, %v673_v8, %v674_v42  ;;  %v2703_v54 = vsel %vm182_vm1, %v674_v42, %v675_v43  ;;  %v2707_v56 = vsel %vm182_vm1, %v675_v43, %v676_v44  ;;  %v2711_v59 = vsel %vm182_vm1, %v676_v44, %v673_v8  ;;  %1929 = vmatprep.subr.mxu0 %v2224_v26  ;;  %v1589_v29 = vld [vmem:[%s3196_s1 + $0x140] sm:$0xff] }
 0x37c   :  { %624 = vrot.lane.b32.xlu0 %v2663_v40, %s2220_s8  ;;  %620 = vrot.lane.b32.xlu1 %v2659_v38, %s2220_s8  ;;  %v1593_v42 = vld [vmem:[%s3196_s1 + $0x160] sm:$0xff]  ;;  %v589_v43 = vmul.f32 %v1589_v29, %v2679_v46  ;;  %v644_v7 = vmul.f32 %v1601_v61, %v2657_v37  ;;  %v1602_v29 = vld [vmem:[%s3196_s1 + $0x1a8] sm:$0xff] }
 0x37d   :  { %v1597_v44 = vld [vmem:[%s3196_s1 + $0x180] sm:$0xff] }
 0x380   :  { %656 = vrot.lane.b32.xlu0 %v2661_v39, %s2221_s0  ;;  %652 = vrot.lane.b32.xlu1 %v2657_v37, %s2221_s0  ;;  %v1598_v37 = vld [vmem:[%s3196_s1 + $0x188] sm:$0xff] }
 0x384   :  { %654 = vrot.lane.b32.xlu1 %v2659_v38, %s2221_s0  ;;  %567 = vrot.lane.b32.xlu0 %v2679_v46, %s2220_s8 }
 0x388   :  { %658 = vrot.lane.b32.xlu1 %v2663_v40, %s2221_s0  ;;  %597 = vrot.lane.b32.xlu0 %v2679_v46, %s2221_s0  ;;  %v1590_v46 = vld [vmem:[%s3196_s1 + $0x148] sm:$0xff] }
 0x389   :  { %v590_v19 = vmul.f32 %v1590_v46, %v2687_v24 }
 0x38c   :  { %571 = vrot.lane.b32.xlu0 %v2683_v47, %s2220_s8  ;;  %569 = vrot.lane.b32.xlu1 %v2687_v24, %s2220_s8 }
 0x390   :  { %573 = vrot.lane.b32.xlu0 %v2691_v49, %s2220_s8  ;;  %599 = vrot.lane.b32.xlu1 %v2687_v24, %s2221_s0  ;;  %v591_v24 = vmul.f32 %v1591_v17, %v2683_v47 }
 0x394   :  { %601 = vrot.lane.b32.xlu0 %v2683_v47, %s2221_s0  ;;  %603 = vrot.lane.b32.xlu1 %v2691_v49, %s2221_s0  ;;  %v1605_v47 = vld [vmem:[%s3196_s1 + $0x1c0] sm:$0xff] }
 0x398   :  { %681 = vrot.lane.b32.xlu0 %v2699_v48, %s2220_s8  ;;  %683 = vrot.lane.b32.xlu1 %v2703_v54, %s2220_s8 }
 0x39c   :  { %685 = vrot.lane.b32.xlu0 %v2707_v56, %s2220_s8  ;;  %715 = vrot.lane.b32.xlu1 %v2699_v48, %s2221_s0 }
 0x3a0   :  { %687 = vrot.lane.b32.xlu0 %v2711_v59, %s2220_s8  ;;  %717 = vrot.lane.b32.xlu1 %v2703_v54, %s2221_s0 }
 0x3a4   :  { %719 = vrot.lane.b32.xlu0 %v2707_v56, %s2221_s0  ;;  %721 = vrot.lane.b32.xlu1 %v2711_v59, %s2221_s0 }
 0x3ea   :  { %v2754_v31 = vpop.permute.xlu0 %622  ;;  %v619_v32 = vpop.permute.xlu1 %618 }
 0x3eb   :  { %v631_v62 = vmul.f32 %v1597_v44, %v619_v32  ;;  %v1600_v44 = vld [vmem:[%s3196_s1 + $0x198] sm:$0xff] }
 0x3ee   :  { %v625_v33 = vpop.permute.xlu0 %624  ;;  %v621_v45 = vpop.permute.xlu1 %620 }
 0x3f2   :  { %v2756_v35 = vpop.permute.xlu0 %656  ;;  %v653_v36 = vpop.permute.xlu1 %652 }
 0x3f6   :  { %v655_v34 = vpop.permute.xlu1 %654  ;;  %v568_v30 = vpop.permute.xlu0 %567 }
 0x3f7   :  { %v580_v8 = vmul.f32 %v1585_v4, %v568_v30  ;;  %v1595_v30 = vld [vmem:[%s3196_s1 + $0x170] sm:$0xff] }
 0x3f9   :  { %v593_v57 = vadd.f32 %v589_v43, %v580_v8  ;;  %v1596_v8 = vld [vmem:[%s3196_s1 + $0x178] sm:$0xff]  ;;  %v1599_v43 = vld [vmem:[%s3196_s1 + $0x190] sm:$0xff] }
 0x3fa   :  { %v2771_v28 = vpop.permute.xlu1 %658  ;;  %v598_v50 = vpop.permute.xlu0 %597 }
 0x3fb   :  { %v610_v58 = vmul.f32 %v1593_v42, %v598_v50  ;;  %v592_v42 = vmul.f32 %v1592_v5, %v2691_v49  ;;  %v632_v50 = vmul.f32 %v1598_v37, %v621_v45  ;;  %v1603_v45 = vld [vmem:[%s3196_s1 + $0x1b0] sm:$0xff]  ;;  %v1610_v5 = vld [vmem:[%s3196_s1 + $0x1e8] sm:$0xff] }
 0x3fd   :  { %v614_v63 = vadd.f32 %v610_v58, %v593_v57  ;;  %v1606_v58 = vld [vmem:[%s3196_s1 + $0x1c8] sm:$0xff] }
 0x3fe   :  { %v572_v11 = vpop.permute.xlu0 %571  ;;  %v570_v0 = vpop.permute.xlu1 %569 }
 0x3ff   :  { %v635_v2 = vadd.f32 %v631_v62, %v614_v63  ;;  %v581_v3 = vmul.f32 %v1586_v60, %v570_v0  ;;  %v582_v21 = vmul.f32 %v1587_v51, %v572_v11  ;;  %v645_v62 = vmul.f32 %v1602_v29, %v2659_v38  ;;  %v1609_v38 = vld [vmem:[%s3196_s1 + $0x1e0] sm:$0xff] }
 0x400   :  { %v633_v51 = vmul.f32 %v1599_v43, %v2754_v31  ;;  %v1607_v31 = vld [vmem:[%s3196_s1 + $0x1d0] sm:$0xff] }
 0x401   :  { %v648_v20 = vadd.f32 %v644_v7, %v635_v2  ;;  %v594_v27 = vadd.f32 %v590_v19, %v581_v3  ;;  %v595_v60 = vadd.f32 %v591_v24, %v582_v21  ;;  %v1604_v2 = vld [vmem:[%s3196_s1 + $0x1b8] sm:$0xff]  ;;  %v634_v3 = vmul.f32 %v1600_v44, %v625_v33 }
 0x402   :  { %v574_v23 = vpop.permute.xlu0 %573  ;;  %v600_v25 = vpop.permute.xlu1 %599  ;;  %v665_v7 = vmul.f32 %v1605_v47, %v653_v36 }
 0x403   :  { %v583_v32 = vmul.f32 %v1588_v13, %v574_v23  ;;  %v611_v4 = vmul.f32 %v1594_v16, %v600_v25  ;;  %v1613_v13 = vld [vmem:[%s3196_s1 + $0x200] sm:$0xff]  ;;  %v666_v16 = vmul.f32 %v1606_v58, %v655_v34  ;;  %v646_v23 = vmul.f32 %v1603_v45, %v2661_v39  ;;  %v1614_v34 = vld [vmem:[%s3196_s1 + $0x208] sm:$0xff] }
 0x404   :  { %v669_v36 = vadd.f32 %v665_v7, %v648_v20  ;;  %v647_v25 = vmul.f32 %v1604_v2, %v2663_v40  ;;  %v707_v24 = vmul.f32 %v1613_v13, %v2699_v48  ;;  %v1611_v20 = vld [vmem:[%s3196_s1 + $0x1f0] sm:$0xff]  ;;  %v1617_v39 = vld [vmem:[%s3196_s1 + $0x220] sm:$0xff]  ;;  %v667_v40 = vmul.f32 %v1607_v31, %v2756_v35  ;;  %v1616_v2 = vld [vmem:[%s3196_s1 + $0x218] sm:$0xff] }
 0x405   :  { %v615_v57 = vadd.f32 %v611_v4, %v594_v27  ;;  %v596_v63 = vadd.f32 %v592_v42, %v583_v32  ;;  %v708_v44 = vmul.f32 %v1614_v34, %v2703_v54  ;;  %v1615_v48 = vld [vmem:[%s3196_s1 + $0x210] sm:$0xff]  ;;  %v1618_v54 = vld [vmem:[%s3196_s1 + $0x228] sm:$0xff] }
 0x406   :  { %v602_v49 = vpop.permute.xlu0 %601  ;;  %v604_v61 = vpop.permute.xlu1 %603 }
 0x407   :  { %v636_v46 = vadd.f32 %v632_v50, %v615_v57  ;;  %v612_v11 = vmul.f32 %v1595_v30, %v602_v49  ;;  %v613_v0 = vmul.f32 %v1596_v8, %v604_v61  ;;  %v1608_v50 = vld [vmem:[%s3196_s1 + $0x1d8] sm:$0xff] }
 0x409   :  { %v616_v17 = vadd.f32 %v612_v11, %v595_v60  ;;  %v617_v19 = vadd.f32 %v613_v0, %v596_v63  ;;  %v649_v37 = vadd.f32 %v645_v62, %v636_v46  ;;  %v1612_v62 = vld [vmem:[%s3196_s1 + $0x1f8] sm:$0xff]  ;;  %v709_v46 = vmul.f32 %v1615_v48, %v2707_v56 }
 0x40a   :  { %v682_v33 = vpop.permute.xlu0 %681  ;;  %v684_v21 = vpop.permute.xlu1 %683  ;;  %v668_v11 = vmul.f32 %v1608_v50, %v2771_v28  ;;  %v1620_v56 = vld [vmem:[%s3196_s1 + $0x238] sm:$0xff]  ;;  %v710_v28 = vmul.f32 %v1616_v2, %v2711_v59 }
 0x40b   :  { %v637_v27 = vadd.f32 %v633_v51, %v616_v17  ;;  %v638_v32 = vadd.f32 %v634_v3, %v617_v19  ;;  %v694_v4 = vmul.f32 %v1609_v38, %v682_v33  ;;  %v670_v29 = vadd.f32 %v666_v16, %v649_v37  ;;  %v1619_v17 = vld [vmem:[%s3196_s1 + $0x230] sm:$0xff] }
 0x40c   :  { %v695_v30 = vmul.f32 %v1610_v5, %v684_v21 }
 0x40d   :  { %v698_v8 = vadd.f32 %v694_v4, %v669_v36  ;;  %v650_v42 = vadd.f32 %v646_v23, %v637_v27  ;;  %v651_v43 = vadd.f32 %v647_v25, %v638_v32 }
 0x40e   :  { %v699_v47 = vadd.f32 %v695_v30, %v670_v29  ;;  %v686_v57 = vpop.permute.xlu0 %685  ;;  %v716_v58 = vpop.permute.xlu1 %715 }
 0x40f   :  { %v671_v60 = vadd.f32 %v667_v40, %v650_v42  ;;  %v696_v49 = vmul.f32 %v1611_v20, %v686_v57  ;;  %v711_v61 = vadd.f32 %v707_v24, %v698_v8  ;;  %v728_v35 = vmul.f32 %v1617_v39, %v716_v58 }
 0x410   :  { %v712_v63 = vadd.f32 %v708_v44, %v699_v47  ;;  %v672_v7 = vadd.f32 %v668_v11, %v651_v43 }
 0x411   :  { %v700_v0 = vadd.f32 %v696_v49, %v671_v60  ;;  %v732_v45 = vadd.f32 %v728_v35, %v711_v61 }
 0x412   :  { %v688_v51 = vpop.permute.xlu0 %687  ;;  %v718_v3 = vpop.permute.xlu1 %717 }
 0x413   :  { %v697_v38 = vmul.f32 %v1612_v62, %v688_v51  ;;  %v729_v13 = vmul.f32 %v1618_v54, %v718_v3  ;;  %1888 = vmatprep.mubr.f32.mxu0 %v732_v45  ;;  %v713_v16 = vadd.f32 %v709_v46, %v700_v0 }
 0x415   :  { %v701_v19 = vadd.f32 %v697_v38, %v672_v7  ;;  %v733_v5 = vadd.f32 %v729_v13, %v712_v63  ;;  %v1621_v38 = vld [vmem:[%s3200_s5 + $0x2] sm:$0x3] }
 0x416   :  { %v720_v37 = vpop.permute.xlu0 %719  ;;  %v722_v31 = vpop.permute.xlu1 %721 }
 0x417   :  { %v730_v33 = vmul.f32 %v1619_v17, %v720_v37  ;;  %v714_v36 = vadd.f32 %v710_v28, %v701_v19  ;;  %v731_v21 = vmul.f32 %v1620_v56, %v722_v31  ;;  %1889 = vmatmul.mubr.f32.vlgmr.msra.gmra.mrb[4].mxu0 %v733_v5 }
 0x418   :  { %1930 = vmatpush3.msra.mxu0 %v2616_v55 }
 0x419   :  { %v734_v23 = vadd.f32 %v730_v33, %v713_v16  ;;  %v735_v25 = vadd.f32 %v731_v21, %v714_v36  ;;  %2156 = vmatprep.subr.bf16.mxu0 %v2222_v52 }
 0x41b   :  { %1891 = vmatprep.mubr.f32.mxu0 %v734_v23 }
 0x41c   :  { %1892 = vmatmul.mubr.f32.gmra.mrb[6].mxu0 %v735_v25 }
 0x41d   :  { %1931 = vmatprep.mubr.msk.f32.mxu0 %vm2223_vm2, %v2224_v26 }
 0x4ea   :  { %v2887_v59 = vpop.f32.mrb[4].mxu0 }
 0x4eb   :  { %v848_v34 = vmul.f32 %v2887_v59, %v2887_v59  ;;  %v2891_v27 = vpop.f32.mrb[5].mxu0 }
 0x4ec   :  { %v838_v32 = vadd.f32 %v2887_v59, %v2891_v27  ;;  %v847_v55 = vmul.f32 %v2891_v27, %v2891_v27 }
 0x4ee   :  { %v851_v4 = vadd.f32 %v848_v34, %v847_v55 }
 0x4ef   :  { %v2897_v29 = vpop.f32.mrb[6].mxu0 }
 0x4f0   :  { %v2899_v24 = vpop.f32.mrb[7].mxu0  ;;  %v850_v39 = vmul.f32 %v2897_v29, %v2897_v29 }
 0x4f1   :  { %v839_v30 = vadd.f32 %v838_v32, %v2899_v24  ;;  %v849_v20 = vmul.f32 %v2899_v24, %v2899_v24 }
 0x4f3   :  { %v840_v40 = vadd.f32 %v2897_v29, %v839_v30  ;;  %v852_v8 = vadd.f32 %v851_v4, %v849_v20 }
 0x4f5   :  { %v841_v42 = vrot.slane %v840_v40, 4  ;;  %v853_v43 = vadd.f32 %v852_v8, %v850_v39 }
 0x4f7   :  { %v842_v44 = vadd.f32 %v841_v42, %v840_v40  ;;  %v854_v48 = vrot.slane %v853_v43, 4  ;;  %v1231_v42 = vld [vmem:[#allocation2 + $0x100] sm:$0xff] }
 0x4f9   :  { %v843_v50 = vrot.slane %v842_v44, 2  ;;  %v855_v47 = vadd.f32 %v854_v48, %v853_v43  ;;  %v1232_v43 = vld [vmem:[#allocation2 + $0x108] sm:$0xff] }
 0x4fb   :  { %v844_v57 = vadd.f32 %v843_v50, %v842_v44  ;;  %v856_v58 = vrot.slane %v855_v47, 2 }
 0x4fd   :  { %v845_v60 = vrot.slane %v844_v57, 1  ;;  %v857_v49 = vadd.f32 %v856_v58, %v855_v47  ;;  %v1233_v58 = vld [vmem:[#allocation2 + $0x110] sm:$0xff] }
 0x4ff   :  { %v858_v61 = vrot.slane %v857_v49, 1  ;;  %v846_v35 = vadd.f32 %v845_v60, %v844_v57  ;;  %v2124_v57 = vpack.c.bf16 %v1232_v43, %v1231_v42  ;;  %v1234_v60 = vld [vmem:[#allocation2 + $0x118] sm:$0xff]  ;;  %v1625_v43 = vld [vmem:[%s3196_s1 + $0x250] sm:$0xff] }
 0x501   :  { %v859_v62 = vadd.f32 %v858_v61, %v857_v49  ;;  %v2128_v49 = vpack.c.bf16 %v1234_v60, %v1233_v58  ;;  %2125 = vmatprep.subr.bf16.mxu1 %v2124_v57  ;;  %v1235_v61 = vld [vmem:[#allocation2 + $0x120] sm:$0xff]  ;;  %v1626_v60 = vld [vmem:[%s3196_s1 + $0x258] sm:$0xff] }
 0x503   :  { %v860_v54 = vsel %vm365_vm3, %v846_v35, %v859_v62  ;;  %v1236_v35 = vld [vmem:[#allocation2 + $0x128] sm:$0xff] }
 0x504   :  { %1927 = vmatmul.mubr.f32.vlgmr.msra.gmra.mrb[4].mxu1 %v860_v54  ;;  %v2132_v62 = vpack.c.bf16 %v1236_v35, %v1235_v61  ;;  %v1237_v54 = vld [vmem:[#allocation2 + $0x130] sm:$0xff] }
 0x505   :  { %2127 = vmatpush3.bf16.msra.mxu1 %v2124_v57  ;;  %v1629_v61 = vld [vmem:[%s3196_s1 + $0x270] sm:$0xff] }
 0x506   :  { %2129 = vmatprep.subr.bf16.mxu1 %v2128_v49 }
 0x509   :  { %2131 = vmatpush3.bf16.msra.mxu1 %v2128_v49  ;;  %v1632_v49 = vld [vmem:[%s3196_s1 + $0x288] sm:$0xff] }
 0x50a   :  { %2133 = vmatprep.subr.bf16.mxu1 %v2132_v62 }
 0x50d   :  { %2135 = vmatpush3.bf16.msra.mxu1 %v2132_v62 }
 0x5d7   :  { %v927_v63 = vpop.f32.mrb[4].mxu1 }
 0x5d8   :  { %v931_v46 = vmul.f32 0.001953125, %v927_v63  ;;  %v1928_v11 = vpop.f32.mrb[5].mxu1  ;;  %v1238_v63 = vld [vmem:[#allocation2 + $0x138] sm:$0xff] }
 0x5d9   :  { %v1239_v11 = vld [vmem:[#allocation2 + $0x140] sm:$0xff] }
 0x5da   :  { %v932_v0 = vmul.f32 %v931_v46, %v931_v46 }
 0x5dc   :  { %v934_v45 = vrot.slane %v932_v0, 7  ;;  %v1240_v0 = vld [vmem:[#allocation2 + $0x148] sm:$0xff] }
 0x5de   :  { %v936_v2 = vsub.f32 %v931_v46, %v934_v45  ;;  %v2140_v45 = vpack.c.bf16 %v1240_v0, %v1239_v11 }
 0x5e0   :  { %v937_v51 = vmax.f32 %v936_v2, 0.0  ;;  %v1241_v2 = vld [vmem:[#allocation2 + $0x150] sm:$0xff] }
 0x5e2   :  { %v940_v3 = vadd.f32 1e-05, %v937_v51  ;;  %v1242_v51 = vld [vmem:[#allocation2 + $0x158] sm:$0xff] }
 0x5e4   :  { %2189 = vrsqrt.f32 %v940_v3  ;;  %v2144_v3 = vpack.c.bf16 %v1242_v51, %v1241_v2  ;;  %v1640_v51 = vld [vmem:[%s3196_s1 + $0x2c8] sm:$0xff] }
 0x5ee   :  { %v2190_v7 = vpop.eup %2189 }
 0x5ef   :  { %v943_v13 = vrot.slane %v2190_v7, 1  ;;  %v1243_v7 = vld [vmem:[#allocation2 + $0x160] sm:$0xff] }
 0x5f1   :  { %v945_v16 = vmul.f32 %v1621_v38, %v943_v13 }
 0x5f3   :  { %v946_v17 = vmul.f32 %v945_v16, %v931_v46  ;;  %v954_v19 = vrot.slane %v945_v16, %v2624_v9  ;;  %v2136_v46 = vpack.c.bf16 %v1238_v63, %v1237_v54  ;;  %v1245_v16 = vld [vmem:[#allocation2 + $0x170] sm:$0xff]  ;;  %v1630_v54 = vld [vmem:[%s3196_s1 + $0x278] sm:$0xff] }
 0x5f5   :  { %v948_v56 = vrot.slane %v946_v17, 7  ;;  %2137 = vmatprep.subr.bf16.mxu1 %v2136_v46  ;;  %v1246_v17 = vld [vmem:[#allocation2 + $0x178] sm:$0xff] }
 0x5f6   :  { %2139 = vmatpush3.bf16.msra.mxu1 %v2136_v46 }
 0x5f7   :  { %v950_v28 = vsub.f32 %v1621_v38, %v948_v56  ;;  %2141 = vmatprep.subr.bf16.mxu1 %v2140_v45  ;;  %v1244_v38 = vld [vmem:[#allocation2 + $0x168] sm:$0xff]  ;;  %v2152_v56 = vpack.c.bf16 %v1246_v17, %v1245_v16  ;;  %v1638_v16 = vld [vmem:[%s3196_s1 + $0x2b8] sm:$0xff] }
 0x5f8   :  { %v2148_v13 = vpack.c.bf16 %v1244_v38, %v1243_v7  ;;  %v1634_v7 = vld [vmem:[%s3196_s1 + $0x298] sm:$0xff] }
 0x5f9   :  { %v958_v5 = vrot.slane %v950_v28, %v2627_v12 }
 0x5fa   :  { %2143 = vmatpush3.bf16.msra.mxu1 %v2140_v45 }
 0x5fb   :  { %v959_v37 = vsel %vm365_vm3, %v954_v19, %v958_v5  ;;  %2145 = vmatprep.subr.bf16.mxu1 %v2144_v3 }
 0x5fc   :  { %1932 = vmatmul.mubr.msk.f32.vlgmr.msra.gmra.mrb[8].mxu0 %vm465_vm4, %v959_v37 }
 0x5fd   :  { %2158 = vmatpush3.bf16.msra.mxu0 %v2386_v53  ;;  %2004 = vmatprep.mubr.msk.f32.mxu0 %vm2223_vm2, %v2224_v26 }
 0x5fe   :  { %2159 = vmatprep.subr.bf16.mxu0 %v2222_v52  ;;  %2147 = vmatpush3.bf16.msra.mxu1 %v2144_v3  ;;  %v1633_v3 = vld [vmem:[%s3196_s1 + $0x290] sm:$0xff] }
 0x5ff   :  { %2149 = vmatprep.subr.bf16.mxu1 %v2148_v13 }
 0x601   :  { %2161 = vmatpush3.bf16.msra.mxu0 %v2522_v6 }
 0x602   :  { %2162 = vmatprep.subr.bf16.mxu0 %v2222_v52  ;;  %2151 = vmatpush3.bf16.msra.mxu1 %v2148_v13  ;;  %v1637_v13 = vld [vmem:[%s3196_s1 + $0x2b0] sm:$0xff] }
 0x603   :  { %2153 = vmatprep.subr.bf16.mxu1 %v2152_v56 }
 0x605   :  { %2164 = vmatpush3.bf16.msra.mxu0 %v2532_v10 }
 0x606   :  { %2165 = vmatprep.subr.bf16.mxu0 %v2222_v52  ;;  %2155 = vmatpush3.bf16.msra.mxu1 %v2152_v56 }
 0x609   :  { %2167 = vmatpush3.bf16.msra.mxu0 %v2542_v14 }
 0x60a   :  { %2168 = vmatprep.subr.bf16.mxu0 %v2222_v52 }
 0x60d   :  { %2170 = vmatpush3.bf16.msra.mxu0 %v2552_v18 }
 0x60e   :  { %2171 = vmatprep.subr.bf16.mxu0 %v2222_v52 }
 0x611   :  { %2173 = vmatpush3.bf16.msra.mxu0 %v2562_v15 }
 0x612   :  { %2174 = vmatprep.subr.bf16.mxu0 %v2222_v52 }
 0x615   :  { %2176 = vmatpush3.bf16.msra.mxu0 %v2572_v22 }
 0x616   :  { %2177 = vmatprep.subr.bf16.mxu0 %v2222_v52 }
 0x619   :  { %2179 = vmatpush3.bf16.msra.mxu0 %v2583_v41 }
 0x61a   :  { %2007 = vmatprep.subr.mxu0 %v2224_v26 }
 0x6cf   :  { %v1029_v53 = vpop.f32.mrb[8].mxu0 }
 0x6d0   :  { %v1036_v6 = vrot.slane %v1029_v53, %v2624_v9  ;;  %v1933_v10 = vpop.f32.mrb[9].mxu0  ;;  %v1044_v14 = vrot.slane %v1029_v53, %v2627_v12 }
 0x6d1   :  { %v1623_v10 = vld [vmem:[%s3196_s1 + $0x240] sm:$0xff] }
 0x6d2   :  { %v1037_v18 = vmul.f32 %v1036_v6, %v2891_v27  ;;  %v1038_v15 = vmul.f32 %v2887_v59, %v1036_v6  ;;  %v1039_v31 = vmul.f32 %v1036_v6, %v2899_v24  ;;  %v1040_v22 = vmul.f32 %v2897_v29, %v1036_v6 }
 0x6d4   :  { %v1045_v33 = vadd.f32 %v1044_v14, %v1037_v18  ;;  %v1046_v52 = vadd.f32 %v1044_v14, %v1038_v15  ;;  %v1047_v36 = vadd.f32 %v1044_v14, %v1039_v31  ;;  %v1048_v41 = vadd.f32 %v1044_v14, %v1040_v22  ;;  %v1627_v14 = vld [vmem:[%s3196_s1 + $0x260] sm:$0xff] }
 0x6d5   :  { %v1631_v22 = vld [vmem:[%s3196_s1 + $0x280] sm:$0xff] }
 0x6d6   :  { %v2941_v21 = vmax.f32 %v1045_v33, 0.0  ;;  %v2943_v23 = vmax.f32 %v1046_v52, 0.0  ;;  %v2945_v25 = vmax.f32 %v1047_v36, 0.0  ;;  %v2947_v34 = vmax.f32 %v1048_v41, 0.0  ;;  %v1635_v52 = vld [vmem:[%s3196_s1 + $0x2a0] sm:$0xff] }
 0x6d8   :  { %1116 = vrot.lane.b32.xlu0 %v2945_v25, %s2220_s8  ;;  %1112 = vrot.lane.b32.xlu1 %v2941_v21, %s2220_s8  ;;  %v1053_v59 = vrot.slane %v2941_v21, 7  ;;  %v1056_v27 = vrot.slane %v2947_v34, 7  ;;  %v1054_v32 = vrot.slane %v2943_v23, 7  ;;  %v1055_v55 = vrot.slane %v2945_v25, 7 }
 0x6d9   :  { %v1167_v4 = vrot.slane %v2941_v21, 1  ;;  %v1168_v29 = vrot.slane %v2943_v23, 1  ;;  %v1169_v24 = vrot.slane %v2945_v25, 1  ;;  %v1170_v30 = vrot.slane %v2947_v34, 1 }
 0x6da   :  { %v2963_v20 = vsel %vm68_vm0, %v1056_v27, %v1053_v59  ;;  %v2967_v39 = vsel %vm68_vm0, %v1054_v32, %v1055_v55  ;;  %v2971_v40 = vsel %vm68_vm0, %v1053_v59, %v1054_v32  ;;  %v2975_v8 = vsel %vm68_vm0, %v1055_v55, %v1056_v27  ;;  %v1624_v32 = vld [vmem:[%s3196_s1 + $0x248] sm:$0xff]  ;;  %v1639_v55 = vld [vmem:[%s3196_s1 + $0x2c0] sm:$0xff] }
 0x6db   :  { %v2983_v44 = vsel %vm182_vm1, %v1167_v4, %v1168_v29  ;;  %v2987_v48 = vsel %vm182_vm1, %v1168_v29, %v1169_v24  ;;  %v2991_v50 = vsel %vm182_vm1, %v1169_v24, %v1170_v30  ;;  %v2995_v47 = vsel %vm182_vm1, %v1170_v30, %v1167_v4  ;;  %v1628_v24 = vld [vmem:[%s3196_s1 + $0x268] sm:$0xff] }
 0x6dc   :  { %1118 = vrot.lane.b32.xlu0 %v2947_v34, %s2220_s8  ;;  %1114 = vrot.lane.b32.xlu1 %v2943_v23, %s2220_s8  ;;  %v1083_v33 = vmul.f32 %v1627_v14, %v2963_v20  ;;  %v1138_v58 = vmul.f32 %v1639_v55, %v2941_v21  ;;  %v1084_v35 = vmul.f32 %v1628_v24, %v2971_v40  ;;  %v1651_v55 = vld [vmem:[%s3196_s1 + $0x320] sm:$0xff] }
 0x6dd   :  { %v1086_v38 = vmul.f32 %v1630_v54, %v2975_v8 }
 0x6e0   :  { %1150 = vrot.lane.b32.xlu0 %v2945_v25, %s2221_s0  ;;  %1146 = vrot.lane.b32.xlu1 %v2941_v21, %s2221_s0  ;;  %v1636_v21 = vld [vmem:[%s3196_s1 + $0x2a8] sm:$0xff] }
 0x6e4   :  { %1148 = vrot.lane.b32.xlu1 %v2943_v23, %s2221_s0  ;;  %1061 = vrot.lane.b32.xlu0 %v2963_v20, %s2220_s8 }
 0x6e8   :  { %1152 = vrot.lane.b32.xlu1 %v2947_v34, %s2221_s0  ;;  %1091 = vrot.lane.b32.xlu0 %v2963_v20, %s2221_s0 }
 0x6ec   :  { %1065 = vrot.lane.b32.xlu0 %v2967_v39, %s2220_s8  ;;  %1063 = vrot.lane.b32.xlu1 %v2971_v40, %s2220_s8 }
 0x6f0   :  { %1067 = vrot.lane.b32.xlu0 %v2975_v8, %s2220_s8  ;;  %1093 = vrot.lane.b32.xlu1 %v2971_v40, %s2221_s0  ;;  %v1085_v40 = vmul.f32 %v1629_v61, %v2967_v39 }
 0x6f4   :  { %1095 = vrot.lane.b32.xlu0 %v2967_v39, %s2221_s0  ;;  %1097 = vrot.lane.b32.xlu1 %v2975_v8, %s2221_s0  ;;  %v1643_v39 = vld [vmem:[%s3196_s1 + $0x2e0] sm:$0xff] }
 0x6f8   :  { %1175 = vrot.lane.b32.xlu0 %v2983_v44, %s2220_s8  ;;  %1177 = vrot.lane.b32.xlu1 %v2987_v48, %s2220_s8 }
 0x6fc   :  { %1179 = vrot.lane.b32.xlu0 %v2991_v50, %s2220_s8  ;;  %1209 = vrot.lane.b32.xlu1 %v2983_v44, %s2221_s0 }
 0x700   :  { %1181 = vrot.lane.b32.xlu0 %v2995_v47, %s2220_s8  ;;  %1211 = vrot.lane.b32.xlu1 %v2987_v48, %s2221_s0 }
 0x704   :  { %1213 = vrot.lane.b32.xlu0 %v2991_v50, %s2221_s0  ;;  %1215 = vrot.lane.b32.xlu1 %v2995_v47, %s2221_s0 }
 0x74a   :  { %v3037_v28 = vpop.permute.xlu0 %1116  ;;  %v1113_v19 = vpop.permute.xlu1 %1112 }
 0x74b   :  { %v1125_v4 = vmul.f32 %v1635_v52, %v1113_v19  ;;  %v1644_v19 = vld [vmem:[%s3196_s1 + $0x2e8] sm:$0xff] }
 0x74e   :  { %v1119_v5 = vpop.permute.xlu0 %1118  ;;  %v1115_v37 = vpop.permute.xlu1 %1114 }
 0x74f   :  { %v1126_v17 = vmul.f32 %v1636_v21, %v1115_v37  ;;  %v1641_v37 = vld [vmem:[%s3196_s1 + $0x2d0] sm:$0xff] }
 0x752   :  { %v3039_v53 = vpop.permute.xlu0 %1150  ;;  %v1147_v6 = vpop.permute.xlu1 %1146 }
 0x756   :  { %v1149_v18 = vpop.permute.xlu1 %1148  ;;  %v1062_v15 = vpop.permute.xlu0 %1061 }
 0x757   :  { %v1074_v31 = vmul.f32 %v1623_v10, %v1062_v15  ;;  %v1139_v15 = vmul.f32 %v1640_v51, %v2943_v23  ;;  %v1647_v23 = vld [vmem:[%s3196_s1 + $0x300] sm:$0xff] }
 0x759   :  { %v1087_v59 = vadd.f32 %v1083_v33, %v1074_v31 }
 0x75a   :  { %v3054_v36 = vpop.permute.xlu1 %1152  ;;  %v1092_v41 = vpop.permute.xlu0 %1091 }
 0x75b   :  { %v1104_v27 = vmul.f32 %v1631_v22, %v1092_v41  ;;  %v1642_v41 = vld [vmem:[%s3196_s1 + $0x2d8] sm:$0xff] }
 0x75d   :  { %v1108_v29 = vadd.f32 %v1104_v27, %v1087_v59  ;;  %v1127_v59 = vmul.f32 %v1637_v13, %v3037_v28  ;;  %v1128_v27 = vmul.f32 %v1638_v16, %v1119_v5  ;;  %v1645_v28 = vld [vmem:[%s3196_s1 + $0x2f0] sm:$0xff] }
 0x75e   :  { %v1066_v30 = vpop.permute.xlu0 %1065  ;;  %v1064_v20 = vpop.permute.xlu1 %1063 }
 0x75f   :  { %v1129_v42 = vadd.f32 %v1125_v4, %v1108_v29  ;;  %v1075_v57 = vmul.f32 %v1624_v32, %v1064_v20  ;;  %v1076_v63 = vmul.f32 %v1625_v43, %v1066_v30  ;;  %v1159_v32 = vmul.f32 %v1643_v39, %v1147_v6  ;;  %v1648_v30 = vld [vmem:[%s3196_s1 + $0x308] sm:$0xff] }
 0x760   :  { %v1160_v4 = vmul.f32 %v1644_v19, %v1149_v18  ;;  %v1140_v43 = vmul.f32 %v1641_v37, %v2945_v25  ;;  %v1652_v18 = vld [vmem:[%s3196_s1 + $0x328] sm:$0xff]  ;;  %v1655_v25 = vld [vmem:[%s3196_s1 + $0x340] sm:$0xff]  ;;  %v1654_v19 = vld [vmem:[%s3196_s1 + $0x338] sm:$0xff] }
 0x761   :  { %v1142_v62 = vadd.f32 %v1138_v58, %v1129_v42  ;;  %v1088_v0 = vadd.f32 %v1084_v35, %v1075_v57  ;;  %v1089_v10 = vadd.f32 %v1085_v40, %v1076_v63  ;;  %v1141_v57 = vmul.f32 %v1642_v41, %v2947_v34 }
 0x762   :  { %v1068_v46 = vpop.permute.xlu0 %1067  ;;  %v1094_v11 = vpop.permute.xlu1 %1093  ;;  %v1201_v35 = vmul.f32 %v1651_v55, %v2983_v44  ;;  %v1161_v34 = vmul.f32 %v1645_v28, %v3039_v53  ;;  %v1653_v44 = vld [vmem:[%s3196_s1 + $0x330] sm:$0xff] }
 0x763   :  { %v1077_v45 = vmul.f32 %v1626_v60, %v1068_v46  ;;  %v1105_v2 = vmul.f32 %v1632_v49, %v1094_v11  ;;  %v1163_v6 = vadd.f32 %v1159_v32, %v1142_v62  ;;  %v1649_v62 = vld [vmem:[%s3196_s1 + $0x310] sm:$0xff]  ;;  %v1202_v11 = vmul.f32 %v1652_v18, %v2987_v48  ;;  %v1656_v48 = vld [vmem:[%s3196_s1 + $0x348] sm:$0xff] }
 0x764   :  { %v1203_v16 = vmul.f32 %v1653_v44, %v2991_v50  ;;  %v1658_v50 = vld [vmem:[%s3196_s1 + $0x358] sm:$0xff] }
 0x765   :  { %v1109_v56 = vadd.f32 %v1105_v2, %v1088_v0  ;;  %v1090_v31 = vadd.f32 %v1086_v38, %v1077_v45  ;;  %v1646_v0 = vld [vmem:[%s3196_s1 + $0x2f8] sm:$0xff] }
 0x766   :  { %v1096_v8 = vpop.permute.xlu0 %1095  ;;  %v1098_v14 = vpop.permute.xlu1 %1097  ;;  %v1650_v38 = vld [vmem:[%s3196_s1 + $0x318] sm:$0xff] }
 0x767   :  { %v1130_v22 = vadd.f32 %v1126_v17, %v1109_v56  ;;  %v1106_v33 = vmul.f32 %v1633_v3, %v1096_v8  ;;  %v1107_v52 = vmul.f32 %v1634_v7, %v1098_v14  ;;  %v1162_v17 = vmul.f32 %v1646_v0, %v3054_v36 }
 0x768   :  { %v1204_v36 = vmul.f32 %v1654_v19, %v2995_v47 }
 0x769   :  { %v1110_v29 = vadd.f32 %v1106_v33, %v1089_v10  ;;  %v1111_v24 = vadd.f32 %v1107_v52, %v1090_v31  ;;  %v1143_v20 = vadd.f32 %v1139_v15, %v1130_v22  ;;  %v1657_v33 = vld [vmem:[%s3196_s1 + $0x350] sm:$0xff] }
 0x76a   :  { %v1176_v5 = vpop.permute.xlu0 %1175  ;;  %v1178_v42 = vpop.permute.xlu1 %1177 }
 0x76b   :  { %v1131_v58 = vadd.f32 %v1127_v59, %v1110_v29  ;;  %v1132_v60 = vadd.f32 %v1128_v27, %v1111_v24  ;;  %v1188_v49 = vmul.f32 %v1647_v23, %v1176_v5  ;;  %v1164_v61 = vadd.f32 %v1160_v4, %v1143_v20 }
 0x76c   :  { %v1189_v54 = vmul.f32 %v1648_v30, %v1178_v42 }
 0x76d   :  { %v1192_v21 = vadd.f32 %v1188_v49, %v1163_v6  ;;  %v1144_v63 = vadd.f32 %v1140_v43, %v1131_v58  ;;  %v1145_v46 = vadd.f32 %v1141_v57, %v1132_v60 }
 0x76e   :  { %v1193_v45 = vadd.f32 %v1189_v54, %v1164_v61  ;;  %v1180_v2 = vpop.permute.xlu0 %1179  ;;  %v1210_v51 = vpop.permute.xlu1 %1209 }
 0x76f   :  { %v1165_v40 = vadd.f32 %v1161_v34, %v1144_v63  ;;  %v1190_v3 = vmul.f32 %v1649_v62, %v1180_v2  ;;  %v1205_v7 = vadd.f32 %v1201_v35, %v1192_v21  ;;  %v1222_v53 = vmul.f32 %v1655_v25, %v1210_v51 }
 0x770   :  { %v1206_v13 = vadd.f32 %v1202_v11, %v1193_v45  ;;  %v1166_v14 = vadd.f32 %v1162_v17, %v1145_v46  ;;  %v2193_v45 = vld [vmem:[%s3199_s4] sm:$0xff] }
 0x771   :  { %v1194_v39 = vadd.f32 %v1190_v3, %v1165_v40  ;;  %v1226_v56 = vadd.f32 %v1222_v53, %v1205_v7 }
 0x772   :  { %v1182_v10 = vpop.permute.xlu0 %1181  ;;  %v1212_v8 = vpop.permute.xlu1 %1211 }
 0x773   :  { %v1191_v15 = vmul.f32 %v1650_v38, %v1182_v10  ;;  %v1223_v31 = vmul.f32 %v1656_v48, %v1212_v8  ;;  %1966 = vmatprep.mubr.f32.mxu1 %v1226_v56  ;;  %v1207_v22 = vadd.f32 %v1203_v16, %v1194_v39  ;;  %v1659_v16 = vld [vmem:[%s3200_s5 + $0x4] sm:$0x3] }
 0x775   :  { %v1195_v52 = vadd.f32 %v1191_v15, %v1166_v14  ;;  %v1227_v37 = vadd.f32 %v1223_v31, %v1206_v13 }
 0x776   :  { %v1214_v41 = vpop.permute.xlu0 %1213  ;;  %v1216_v59 = vpop.permute.xlu1 %1215 }
 0x777   :  { %v1224_v27 = vmul.f32 %v1657_v33, %v1214_v41  ;;  %v1208_v32 = vadd.f32 %v1204_v36, %v1195_v52  ;;  %v1225_v23 = vmul.f32 %v1658_v50, %v1216_v59  ;;  %1967 = vmatmul.mubr.f32.vlgmr.msra.gmra.mrb[6].mxu1 %v1227_v37 }
 0x779   :  { %v1228_v55 = vadd.f32 %v1224_v27, %v1207_v22  ;;  %v1229_v4 = vadd.f32 %v1225_v23, %v1208_v32 }
 0x77b   :  { %1969 = vmatprep.mubr.f32.mxu1 %v1228_v55 }
 0x77c   :  { %1970 = vmatmul.mubr.f32.gmra.mrb[8].mxu1 %v1229_v4 }
 0x84a   :  { %v1968_v29 = vpop.f32.mrb[6].mxu1 }
 0x84b   :  { %v1342_v24 = vmul.f32 %v1968_v29, %v1968_v29  ;;  %v1313_v30 = vpop.f32.mrb[7].mxu1 }
 0x84c   :  { %v1332_v20 = vadd.f32 %v1968_v29, %v1313_v30  ;;  %v1341_v28 = vmul.f32 %v1313_v30, %v1313_v30 }
 0x84e   :  { %v1345_v5 = vadd.f32 %v1342_v24, %v1341_v28 }
 0x84f   :  { %v1971_v6 = vpop.f32.mrb[8].mxu1 }
 0x850   :  { %v1323_v47 = vpop.f32.mrb[9].mxu1  ;;  %v1344_v57 = vmul.f32 %v1971_v6, %v1971_v6 }
 0x851   :  { %v1333_v42 = vadd.f32 %v1332_v20, %v1323_v47  ;;  %v1343_v43 = vmul.f32 %v1323_v47, %v1323_v47 }
 0x853   :  { %v1334_v18 = vadd.f32 %v1971_v6, %v1333_v42  ;;  %v1346_v58 = vadd.f32 %v1345_v5, %v1343_v43 }
 0x855   :  { %v1335_v60 = vrot.slane %v1334_v18, 4  ;;  %v1347_v49 = vadd.f32 %v1346_v58, %v1344_v57 }
 0x857   :  { %v1336_v61 = vadd.f32 %v1335_v60, %v1334_v18  ;;  %v1348_v35 = vrot.slane %v1347_v49, 4 }
 0x859   :  { %v1337_v54 = vrot.slane %v1336_v61, 2  ;;  %v1349_v62 = vadd.f32 %v1348_v35, %v1347_v49 }
 0x85b   :  { %v1338_v25 = vadd.f32 %v1337_v54, %v1336_v61  ;;  %v1350_v34 = vrot.slane %v1349_v62, 2 }
 0x85d   :  { %v1339_v21 = vrot.slane %v1338_v25, 1  ;;  %v1351_v63 = vadd.f32 %v1350_v34, %v1349_v62 }
 0x85f   :  { %v1352_v46 = vrot.slane %v1351_v63, 1  ;;  %v1340_v11 = vadd.f32 %v1339_v21, %v1338_v25 }
 0x861   :  { %v1353_v44 = vadd.f32 %v1352_v46, %v1351_v63 }
 0x863   :  { %v1354_v0 = vsel %vm365_vm3, %v1340_v11, %v1353_v44 }
 0x864   :  { %2005 = vmatmul.mubr.f32.vlgmr.msra.gmra.mrb[10].mxu0 %v1354_v0 }
 0x865   :  { %2008 = vmatpush3.msra.mxu0 %v2193_v45  ;;  %2009 = vmatprep.mubr.msk.f32.mxu0 %vm2223_vm2, %v2224_v26 }
 0x937   :  { %v1421_v2 = vpop.f32.mrb[10].mxu0 }
 0x938   :  { %v1425_v51 = vmul.f32 0.001953125, %v1421_v2  ;;  %v2006_v40 = vpop.f32.mrb[11].mxu0 }
 0x93a   :  { %v1426_v3 = vmul.f32 %v1425_v51, %v1425_v51 }
 0x93c   :  { %v1428_v7 = vrot.slane %v1426_v3, 7 }
 0x93e   :  { %v1430_v53 = vsub.f32 %v1425_v51, %v1428_v7 }
 0x940   :  { %v1431_v38 = vmax.f32 %v1430_v53, 0.0 }
 0x942   :  { %v1434_v48 = vadd.f32 1e-05, %v1431_v38 }
 0x944   :  { %2191 = vrsqrt.f32 %v1434_v48 }
 0x94e   :  { %v2192_v13 = vpop.eup %2191 }
 0x94f   :  { %v1437_v17 = vrot.slane %v2192_v13, 1 }
 0x951   :  { %v1439_v39 = vmul.f32 %v1659_v16, %v1437_v17 }
 0x953   :  { %v1440_v56 = vmul.f32 %v1439_v39, %v1425_v51  ;;  %v1448_v26 = vrot.slane %v1439_v39, %v2624_v9 }
 0x955   :  { %v1442_v19 = vrot.slane %v1440_v56, 7 }
 0x957   :  { %v1444_v10 = vsub.f32 %v1659_v16, %v1442_v19 }
 0x959   :  { %v1452_v8 = vrot.slane %v1444_v10, %v2627_v12 }
 0x95b   :  { %v1453_v14 = vsel %vm365_vm3, %v1448_v26, %v1452_v8 }
 0x95c   :  { %2010 = vmatmul.mubr.msk.f32.vlgmr.msra.gmra.mrb[12].mxu0 %vm465_vm4, %v1453_v14 }
 0xa2f   :  { %v1523_v15 = vpop.f32.mrb[12].mxu0 }
 0xa30   :  { %v1530_v31 = vrot.slane %v1523_v15, %v2624_v9  ;;  %v2011_v22 = vpop.f32.mrb[13].mxu0  ;;  %v1538_v33 = vrot.slane %v1523_v15, %v2627_v12 }
 0xa32   :  { %v1531_v50 = vmul.f32 %v1530_v31, %v1313_v30  ;;  %v1532_v36 = vmul.f32 %v1968_v29, %v1530_v31  ;;  %v1533_v52 = vmul.f32 %v1530_v31, %v1323_v47  ;;  %v1534_v37 = vmul.f32 %v1971_v6, %v1530_v31 }
 0xa34   :  { %v1539_v41 = vadd.f32 %v1538_v33, %v1531_v50  ;;  %v1540_v59 = vadd.f32 %v1538_v33, %v1532_v36  ;;  %v1541_v27 = vadd.f32 %v1538_v33, %v1533_v52  ;;  %v1542_v32 = vadd.f32 %v1538_v33, %v1534_v37 }
 0xa36   :  { %1543 = vst [vmem:[%s3201_s6] sm:$0xff] %v1539_v41  ;;  %1544 = vst [vmem:[%s3201_s6 + $0x8] sm:$0xff] %v1540_v59 }
 0xa37   :  { %1545 = vst [vmem:[%s3201_s6 + $0x10] sm:$0xff] %v1541_v27  ;;  %1546 = vst [vmem:[%s3201_s6 + $0x18] sm:$0xff] %v1542_v32 }
 0xa38   :  { %1551 = vsyncpa [#allocation3], 1 }

</bundles_post_ra>
